<compile_context>
chip_gen: v7x
topology: tpu7x:2x2x1
jax: 0.10.0
libtpu: 0.0.40
codegen_flags: <defaults>
</compile_context>

<pallas_src>
from collections import namedtuple
import functools

import jax
import jax.numpy as jnp
from jax import lax
from jax.experimental import pallas as pl
from jax.experimental.pallas import tpu as pltpu


# ----------------------------------------------------------------------------
# Fused Pallas kernel (wavefronted LSTM layers + FC in one invocation)
# ----------------------------------------------------------------------------
def _make_fused_lstm_kernel(num_layers, T, Bp, H):
    """Builds the fused kernel.

    Ref order (positional):
      inputs : x_p   (T*Bp, D)   time-major, batch padded to Bp
               h0_p  (L, Bp, H)  padded initial hidden state
               c0_p  (L, Bp, H)  padded initial cell state
               w_ih0 (D, 4H)     layer-0 input weights
               w_rec (L*H, L*4H) packed recurrent + inter-layer weights
               b_rec (1, L*4H)   packed per-layer biases (b_ih + b_hh)
               fc_w  (H, O), fc_b (1, O)
      outputs: msg (T*Bp, O), hT (L, Bp, H), cT (L, Bp, H)
      scratch: xw_s VMEM (T*Bp, 4H) f32  -- hoisted layer-0 projection
               y_s  VMEM (T*Bp, H)  f32  -- top-layer output slab (for FC)
    """
    L = num_layers

    def kernel(x_ref, h0_ref, c0_ref, w_ih0_ref, w_rec_ref, b_rec_ref,
               fc_w_ref, fc_b_ref, msg_ref, hT_ref, cT_ref, xw_s, y_s):
        f32 = jnp.float32

        # Hoisted layer-0 input projection: ONE big well-shaped matmul,
        # staged into VMEM and read back per step as aligned (Bp, 4H) tiles.
        xw_s[...] = jnp.dot(x_ref[...].astype(f32), w_ih0_ref[...],
                            preferred_element_type=f32)

        w_rec = w_rec_ref[...].astype(f32)          # (L*H, L*4H), loop-invariant
        b_rec = b_rec_ref[...].astype(f32)          # (1, L*4H)

        # Lane-constant scale for the fused gate nonlinearity:
        #   sigmoid(x) = 0.5*tanh(0.5*x) + 0.5 ;  tanh(x) = 1.0*tanh(1.0*x) + 0.0
        # act = tanh(g * alpha) * alpha + (1 - alpha), alpha = 0.5 (i,f,o) / 1.0 (g)
        col = lax.broadcasted_iota(jnp.int32, (1, 4 * H), 1)
        alpha = jnp.where((col >= 2 * H) & (col < 3 * H), 1.0, 0.5).astype(f32)
        beta = 1.0 - alpha

        def gate_act(g):                            # (Bp, 4H) -> (Bp, 4H)
            return jnp.tanh(g * alpha) * alpha + beta

        h = [h0_ref[l].astype(f32) for l in range(L)]   # each (Bp, H)
        c = [c0_ref[l].astype(f32) for l in range(L)]

        # Wavefront: at step s, layer l processes time t = s - l.
        # Fully unrolled (T, L small & static).
        for s in range(T + L - 1):
            h_cat = h[0] if L == 1 else jnp.concatenate(h, axis=-1)  # (Bp, L*H)
            # One block matmul produces ALL layers' gate pre-activations:
            #   block l = h[l] @ w_hh_l + h[l-1] @ w_ih_l (+ b_l)
            gates_all = jnp.dot(h_cat, w_rec,
                                preferred_element_type=f32) + b_rec  # (Bp, L*4H)

            for l in range(L):
                t = s - l
                if 0 <= t < T:                      # static python condition
                    g_blk = gates_all[:, l * 4 * H:(l + 1) * 4 * H]  # vreg-aligned
                    if l == 0:
                        g_blk = g_blk + xw_s[t * Bp:(t + 1) * Bp, :]
                    act = gate_act(g_blk)           # ONE tanh for all 4 gates
                    i_g = act[:, 0 * H:1 * H]
                    f_g = act[:, 1 * H:2 * H]
                    g_g = act[:, 2 * H:3 * H]
                    o_g = act[:, 3 * H:4 * H]
                    c[l] = f_g * c[l] + i_g * g_g
                    h[l] = o_g * jnp.tanh(c[l])
                    if l == L - 1:                  # top layer: stash for FC
                        y_s[t * Bp:(t + 1) * Bp, :] = h[l]

        for l in range(L):
            hT_ref[l] = h[l].astype(hT_ref.dtype)
            cT_ref[l] = c[l].astype(cT_ref.dtype)

        # Final fully-connected layer over the whole top-layer slab (off the
        # serial recurrence chain).
        msg_ref[...] = (jnp.dot(y_s[...], fc_w_ref[...],
                                preferred_element_type=f32)
                        + fc_b_ref[...]).astype(msg_ref.dtype)

    return kernel


# ----------------------------------------------------------------------------
# Wrapper around pallas_call
# ----------------------------------------------------------------------------
def fused_lstm_fc(x_p, h0_p, c0_p, packed, num_layers, T, Bp, H):
    """x_p: (T*Bp, D) time-major, batch padded. Returns msg/hT/cT (padded)."""
    TBp, D = x_p.shape
    L = num_layers
    O = packed["fc_w"].shape[-1]
    dt = x_p.dtype

    args = [x_p, h0_p, c0_p, packed["w_ih0"], packed["w_rec"],
            packed["b_rec"], packed["fc_w"], packed["fc_b"]]

    in_specs = [
        pl.BlockSpec((TBp, D), lambda i: (0, 0)),
        pl.BlockSpec((L, Bp, H), lambda i: (0, 0, 0)),
        pl.BlockSpec((L, Bp, H), lambda i: (0, 0, 0)),
        pl.BlockSpec(packed["w_ih0"].shape, lambda i: (0, 0)),
        pl.BlockSpec(packed["w_rec"].shape, lambda i: (0, 0)),
        pl.BlockSpec(packed["b_rec"].shape, lambda i: (0, 0)),
        pl.BlockSpec(packed["fc_w"].shape, lambda i: (0, 0)),
        pl.BlockSpec(packed["fc_b"].shape, lambda i: (0, 0)),
    ]

    out_shapes = (
        jax.ShapeDtypeStruct((TBp, O), dt),
        jax.ShapeDtypeStruct((L, Bp, H), dt),
        jax.ShapeDtypeStruct((L, Bp, H), dt),
    )
    out_specs = [
        pl.BlockSpec((TBp, O), lambda i: (0, 0)),
        pl.BlockSpec((L, Bp, H), lambda i: (0, 0, 0)),
        pl.BlockSpec((L, Bp, H), lambda i: (0, 0, 0)),
    ]

    grid_spec = pltpu.PrefetchScalarGridSpec(
        num_scalar_prefetch=0,
        grid=(1,),
        in_specs=in_specs,
        out_specs=out_specs,
        scratch_shapes=[
            pltpu.VMEM((TBp, 4 * H), jnp.float32),   # hoisted layer-0 projection
            pltpu.VMEM((TBp, H), jnp.float32),       # top-layer output slab
        ],
    )

    kernel = _make_fused_lstm_kernel(num_layers, T, Bp, H)
    msg, hT, cT = pl.pallas_call(
        kernel,
        out_shape=out_shapes,
        grid_spec=grid_spec,
        compiler_params=pltpu.CompilerParams(
            dimension_semantics=("arbitrary",)),
    )(*args)
    return msg, hT, cT


# ----------------------------------------------------------------------------
# Module-level forward (matches Lstm.forward semantics, batch_first)
# ----------------------------------------------------------------------------
@functools.partial(jax.jit, static_argnums=(4,))
def lstm_module_forward(inputs, h_state, c_state, packed, num_layers):
    """inputs: (B, T, D) batch_first; h_state/c_state: (L, B, H).

    Returns (message (B, T, O), h_state (L, B, H), c_state (L, B, H)).
    """
    B, T, D = inputs.shape
    L, _, H = h_state.shape
    Bp = ((B + 7) // 8) * 8                          # pad batch to sublane tile

    # batch_first -> time-major, zero-pad batch rows, flatten (row order t*Bp+b)
    x_tm = jnp.transpose(inputs, (1, 0, 2))                          # (T, B, D)
    x_p = jnp.pad(x_tm, ((0, 0), (0, Bp - B), (0, 0))).reshape(T * Bp, D)
    h_p = jnp.pad(h_state, ((0, 0), (0, Bp - B), (0, 0)))            # (L, Bp, H)
    c_p = jnp.pad(c_state, ((0, 0), (0, Bp - B), (0, 0)))

    msg, hT, cT = fused_lstm_fc(x_p, h_p, c_p, packed, num_layers, T, Bp, H)

    O = msg.shape[-1]
    msg = msg.reshape(T, Bp, O)[:, :B, :].transpose(1, 0, 2)         # (B, T, O)
    return msg, hT[:, :B, :], cT[:, :B, :]


# ----------------------------------------------------------------------------
# Weight packing (done once, at parameter-construction time)
# ----------------------------------------------------------------------------
def pack_params(lstm_params, fc_w, fc_b, H):
    """lstm_params: list of (w_ih (Din,4H), w_hh (H,4H), b (1,4H)) per layer.

    Builds the block-bidiagonal recurrent/inter-layer weight matrix:
        gates_l = h_l @ w_hh_l + h_{l-1} @ w_ih_l  (+ b_l)   for l >= 1
        gates_0 = h_0 @ w_hh_0                      (+ b_0)  (x@w_ih_0 hoisted)
    """
    L = len(lstm_params)
    w_rec = jnp.zeros((L * H, L * 4 * H), jnp.float32)
    for l in range(L):
        w_ih, w_hh, _ = lstm_params[l]
        w_rec = w_rec.at[l * H:(l + 1) * H, l * 4 * H:(l + 1) * 4 * H].set(w_hh)
        if l >= 1:
            w_rec = w_rec.at[(l - 1) * H:l * H,
                             l * 4 * H:(l + 1) * 4 * H].set(w_ih)
    b_rec = jnp.concatenate([lstm_params[l][2] for l in range(L)], axis=-1)
    return {"w_ih0": lstm_params[0][0], "w_rec": w_rec, "b_rec": b_rec,
            "fc_w": fc_w, "fc_b": fc_b}


# ----------------------------------------------------------------------------
# Pure-JAX reference (for correctness check)
# ----------------------------------------------------------------------------
def reference_forward(inputs, h_state, c_state, params, num_layers):
    B, T, _ = inputs.shape
    H = h_state.shape[-1]
    x = jnp.transpose(inputs, (1, 0, 2))
    h_finals, c_finals = [], []
    for l in range(num_layers):
        w_ih, w_hh, b = params["lstm"][l]
        h, c = h_state[l], c_state[l]
        ys = []
        for t in range(T):
            gates = x[t] @ w_ih + h @ w_hh + b
            i_g = jax.nn.sigmoid(gates[:, 0 * H:1 * H])
            f_g = jax.nn.sigmoid(gates[:, 1 * H:2 * H])
            g_g = jnp.tanh(gates[:, 2 * H:3 * H])
            o_g = jax.nn.sigmoid(gates[:, 3 * H:4 * H])
            c = f_g * c + i_g * g_g
            h = o_g * jnp.tanh(c)
            ys.append(h)
        x = jnp.stack(ys)
        h_finals.append(h)
        c_finals.append(c)
    msg = x.reshape(T * B, H) @ params["fc_w"] + params["fc_b"]
    O = msg.shape[-1]
    msg = msg.reshape(T, B, O).transpose(1, 0, 2)
    return msg, jnp.stack(h_finals), jnp.stack(c_finals)


# ----------------------------------------------------------------------------
if __name__ == "__main__":
    Pa = namedtuple("Pa", ["lstm_input_dim", "lstm_hidden_size",
                           "lstm_num_layers", "lstm_output_dim"])
    pa = Pa(lstm_input_dim=16, lstm_hidden_size=32,
            lstm_num_layers=2, lstm_output_dim=8)

    B, T = 2, 8
    D, H, L, O = (pa.lstm_input_dim, pa.lstm_hidden_size,
                  pa.lstm_num_layers, pa.lstm_output_dim)

    key = jax.random.PRNGKey(0)
    k_inp, k_h, k_c, k_par = jax.random.split(key, 4)

    inputs = jax.random.normal(k_inp, (B, T, D), dtype=jnp.float32)
    h_state = jax.random.normal(k_h, (L, B, H), dtype=jnp.float32)
    c_state = jax.random.normal(k_c, (L, B, H), dtype=jnp.float32)

    # Deterministic parameter init (PyTorch-style uniform(-1/sqrt(H), 1/sqrt(H)))
    bound = 1.0 / jnp.sqrt(jnp.float32(H))
    lstm_params = []
    pk = k_par
    for l in range(L):
        in_dim = D if l == 0 else H
        pk, k1, k2, k3, k4 = jax.random.split(pk, 5)
        w_ih = jax.random.uniform(k1, (in_dim, 4 * H), jnp.float32, -bound, bound)
        w_hh = jax.random.uniform(k2, (H, 4 * H), jnp.float32, -bound, bound)
        b_ih = jax.random.uniform(k3, (4 * H,), jnp.float32, -bound, bound)
        b_hh = jax.random.uniform(k4, (4 * H,), jnp.float32, -bound, bound)
        lstm_params.append((w_ih, w_hh, (b_ih + b_hh).reshape(1, 4 * H)))
    pk, k5, k6 = jax.random.split(pk, 3)
    fc_w = jax.random.uniform(k5, (H, O), jnp.float32, -bound, bound)
    fc_b = jax.random.uniform(k6, (O,), jnp.float32, -bound, bound).reshape(1, O)

    packed = pack_params(lstm_params, fc_w, fc_b, H)
    params_ref = {"lstm": tuple(lstm_params), "fc_w": fc_w, "fc_b": fc_b}

    msg, h_out, c_out = lstm_module_forward(inputs, h_state, c_state, packed, L)
    jax.block_until_ready((msg, h_out, c_out))

    # Correctness check against pure-JAX reference
    msg_r, h_r, c_r = reference_forward(inputs, h_state, c_state, params_ref, L)
    assert msg.shape == (B, T, O) and h_out.shape == (L, B, H) and c_out.shape == (L, B, H)
    assert jnp.allclose(msg, msg_r, rtol=1e-4, atol=1e-4)
    assert jnp.allclose(h_out, h_r, rtol=1e-4, atol=1e-4)
    assert jnp.allclose(c_out, c_r, rtol=1e-4, atol=1e-4)

    print("KERNEL_OK")
</pallas_src>

<mosaic_0001>
module attributes {stable_mosaic.version = 11 : i64} {
  func.func @kernel(%arg0: i32, %arg1: memref<64x16xf32, #tpu.memory_space<vmem>>, %arg2: memref<2x8x32xf32, #tpu.memory_space<vmem>>, %arg3: memref<2x8x32xf32, #tpu.memory_space<vmem>>, %arg4: memref<16x128xf32, #tpu.memory_space<vmem>>, %arg5: memref<64x256xf32, #tpu.memory_space<vmem>>, %arg6: memref<1x256xf32, #tpu.memory_space<vmem>>, %arg7: memref<32x8xf32, #tpu.memory_space<vmem>>, %arg8: memref<1x8xf32, #tpu.memory_space<vmem>>, %arg9: memref<64x8xf32, #tpu.memory_space<vmem>>, %arg10: memref<2x8x32xf32, #tpu.memory_space<vmem>>, %arg11: memref<2x8x32xf32, #tpu.memory_space<vmem>>, %arg12: memref<64x128xf32, #tpu.memory_space<vmem>>, %arg13: memref<64x32xf32, #tpu.memory_space<vmem>>) attributes {dimension_semantics = [#tpu.dimension_semantics<arbitrary>], iteration_bounds = array<i64: 1>, scalar_prefetch = 0 : i64, scratch_operands = 2 : i64, tpu.core_type = #tpu.core_type<tc>, window_params = [{pipeline_mode = #tpu.pipeline_mode<synchronous>, transform_indices = @transform_0, window_bounds = array<i64: 64, 16>}, {pipeline_mode = #tpu.pipeline_mode<synchronous>, transform_indices = @transform_1, window_bounds = array<i64: 2, 8, 32>}, {pipeline_mode = #tpu.pipeline_mode<synchronous>, transform_indices = @transform_2, window_bounds = array<i64: 2, 8, 32>}, {pipeline_mode = #tpu.pipeline_mode<synchronous>, transform_indices = @transform_3, window_bounds = array<i64: 16, 128>}, {pipeline_mode = #tpu.pipeline_mode<synchronous>, transform_indices = @transform_4, window_bounds = array<i64: 64, 256>}, {pipeline_mode = #tpu.pipeline_mode<synchronous>, transform_indices = @transform_5, window_bounds = array<i64: 1, 256>}, {pipeline_mode = #tpu.pipeline_mode<synchronous>, transform_indices = @transform_6, window_bounds = array<i64: 32, 8>}, {pipeline_mode = #tpu.pipeline_mode<synchronous>, transform_indices = @transform_7, window_bounds = array<i64: 1, 8>}, {pipeline_mode = #tpu.pipeline_mode<synchronous>, transform_indices = @transform_8, window_bounds = array<i64: 64, 8>}, {pipeline_mode = #tpu.pipeline_mode<synchronous>, transform_indices = @transform_9, window_bounds = array<i64: 2, 8, 32>}, {pipeline_mode = #tpu.pipeline_mode<synchronous>, transform_indices = @transform_10, window_bounds = array<i64: 2, 8, 32>}]} {
    %c0 = arith.constant 0 : index
    %c0_0 = arith.constant 0 : index
    %0 = vector.load %arg1[%c0, %c0_0] : memref<64x16xf32, #tpu.memory_space<vmem>>, vector<64x16xf32>
    %c0_1 = arith.constant 0 : index
    %c0_2 = arith.constant 0 : index
    %1 = vector.load %arg4[%c0_1, %c0_2] : memref<16x128xf32, #tpu.memory_space<vmem>>, vector<16x128xf32>
    %cst = arith.constant dense<0.000000e+00> : vector<64x128xf32>
    %2 = tpu.matmul %0, %1, %cst {dimension_numbers = #tpu.dot_dimension_numbers<[1], [0], [0], [1], [0, 0, 1, 1], [], []>} : vector<64x16xf32>, vector<16x128xf32>, vector<64x128xf32> -> vector<64x128xf32>
    %c0_3 = arith.constant 0 : index
    %c0_4 = arith.constant 0 : index
    %3 = vector.load %arg12[%c0_3, %c0_4] : memref<64x128xf32, #tpu.memory_space<vmem>>, vector<64x128xf32>
    tpu.vector_store %arg12[%c0_3, %c0_4], %2 {strides = array<i32>} : memref<64x128xf32, #tpu.memory_space<vmem>>, vector<64x128xf32>,
    %c0_5 = arith.constant 0 : index
    %c0_6 = arith.constant 0 : index
    %4 = vector.load %arg5[%c0_5, %c0_6] : memref<64x256xf32, #tpu.memory_space<vmem>>, vector<64x256xf32>
    %c0_7 = arith.constant 0 : index
    %c0_8 = arith.constant 0 : index
    %5 = vector.load %arg6[%c0_7, %c0_8] : memref<1x256xf32, #tpu.memory_space<vmem>>, vector<1x256xf32>
    %6 = tpu.iota {dimensions = array<i32: 1>} : vector<1x128xi32>
    %c64_i32 = arith.constant 64 : i32
    %7 = vector.broadcast %c64_i32 : i32 to vector<1x128xi32>
    %8 = arith.cmpi sge, %6, %7 : vector<1x128xi32>
    %c96_i32 = arith.constant 96 : i32
    %9 = vector.broadcast %c96_i32 : i32 to vector<1x128xi32>
    %10 = arith.cmpi slt, %6, %9 : vector<1x128xi32>
    %11 = arith.andi %8, %10 : vector<1x128xi1>
    %cst_9 = arith.constant 1.000000e+00 : f32
    %cst_10 = arith.constant 5.000000e-01 : f32
    %12 = vector.broadcast %cst_9 : f32 to vector<1x128xf32>
    %13 = vector.broadcast %cst_10 : f32 to vector<1x128xf32>
    %14 = arith.select %11, %12, %13 : vector<1x128xi1>, vector<1x128xf32>
    %cst_11 = arith.constant 1.000000e+00 : f32
    %15 = vector.broadcast %cst_11 : f32 to vector<1x128xf32>
    %16 = arith.subf %15, %14 : vector<1x128xf32>
    %c0_12 = arith.constant 0 : index
    %c0_13 = arith.constant 0 : index
    %c0_14 = arith.constant 0 : index
    %17 = vector.load %arg2[%c0_12, %c0_13, %c0_14] : memref<2x8x32xf32, #tpu.memory_space<vmem>>, vector<1x8x32xf32>
    %18 = vector.shape_cast %17 : vector<1x8x32xf32> to vector<8x32xf32>
    %c1 = arith.constant 1 : index
    %c0_15 = arith.constant 0 : index
    %c0_16 = arith.constant 0 : index
    %19 = vector.load %arg2[%c1, %c0_15, %c0_16] : memref<2x8x32xf32, #tpu.memory_space<vmem>>, vector<1x8x32xf32>
    %20 = vector.shape_cast %19 : vector<1x8x32xf32> to vector<8x32xf32>
    %c0_17 = arith.constant 0 : index
    %c0_18 = arith.constant 0 : index
    %c0_19 = arith.constant 0 : index
    %21 = vector.load %arg3[%c0_17, %c0_18, %c0_19] : memref<2x8x32xf32, #tpu.memory_space<vmem>>, vector<1x8x32xf32>
    %22 = vector.shape_cast %21 : vector<1x8x32xf32> to vector<8x32xf32>
    %c1_20 = arith.constant 1 : index
    %c0_21 = arith.constant 0 : index
    %c0_22 = arith.constant 0 : index
    %23 = vector.load %arg3[%c1_20, %c0_21, %c0_22] : memref<2x8x32xf32, #tpu.memory_space<vmem>>, vector<1x8x32xf32>
    %24 = vector.shape_cast %23 : vector<1x8x32xf32> to vector<8x32xf32>
    %25 = tpu.concatenate %18, %20 in 1 : vector<8x32xf32>, vector<8x32xf32> -> vector<8x64xf32>
    %cst_23 = arith.constant dense<0.000000e+00> : vector<8x256xf32>
    %26 = tpu.matmul %25, %4, %cst_23 {dimension_numbers = #tpu.dot_dimension_numbers<[1], [0], [0], [1], [0, 0, 1, 1], [], []>} : vector<8x64xf32>, vector<64x256xf32>, vector<8x256xf32> -> vector<8x256xf32>
    %27 = vector.broadcast %5 : vector<1x256xf32> to vector<8x256xf32>
    %28 = arith.addf %26, %27 : vector<8x256xf32>
    %29 = vector.extract_strided_slice %28 {offsets = [0, 0], sizes = [8, 128], strides = [1, 1]} : vector<8x256xf32> to vector<8x128xf32>
    %c0_24 = arith.constant 0 : index
    %c0_25 = arith.constant 0 : index
    %30 = vector.load %arg12[%c0_24, %c0_25] : memref<64x128xf32, #tpu.memory_space<vmem>>, vector<8x128xf32>
    %31 = arith.addf %29, %30 : vector<8x128xf32>
    %32 = vector.broadcast %14 : vector<1x128xf32> to vector<8x128xf32>
    %33 = arith.mulf %31, %32 : vector<8x128xf32>
    %34 = math.tanh %33 : vector<8x128xf32>
    %35 = vector.broadcast %14 : vector<1x128xf32> to vector<8x128xf32>
    %36 = arith.mulf %34, %35 : vector<8x128xf32>
    %37 = vector.broadcast %16 : vector<1x128xf32> to vector<8x128xf32>
    %38 = arith.addf %36, %37 : vector<8x128xf32>
    %39 = vector.extract_strided_slice %38 {offsets = [0, 0], sizes = [8, 32], strides = [1, 1]} : vector<8x128xf32> to vector<8x32xf32>
    %40 = vector.extract_strided_slice %38 {offsets = [0, 32], sizes = [8, 32], strides = [1, 1]} : vector<8x128xf32> to vector<8x32xf32>
    %41 = vector.extract_strided_slice %38 {offsets = [0, 64], sizes = [8, 32], strides = [1, 1]} : vector<8x128xf32> to vector<8x32xf32>
    %42 = vector.extract_strided_slice %38 {offsets = [0, 96], sizes = [8, 32], strides = [1, 1]} : vector<8x128xf32> to vector<8x32xf32>
    %43 = arith.mulf %40, %22 : vector<8x32xf32>
    %44 = arith.mulf %39, %41 : vector<8x32xf32>
    %45 = arith.addf %43, %44 : vector<8x32xf32>
    %46 = math.tanh %45 : vector<8x32xf32>
    %47 = arith.mulf %42, %46 : vector<8x32xf32>
    %48 = tpu.concatenate %47, %20 in 1 : vector<8x32xf32>, vector<8x32xf32> -> vector<8x64xf32>
    %cst_26 = arith.constant dense<0.000000e+00> : vector<8x256xf32>
    %49 = tpu.matmul %48, %4, %cst_26 {dimension_numbers = #tpu.dot_dimension_numbers<[1], [0], [0], [1], [0, 0, 1, 1], [], []>} : vector<8x64xf32>, vector<64x256xf32>, vector<8x256xf32> -> vector<8x256xf32>
    %50 = vector.broadcast %5 : vector<1x256xf32> to vector<8x256xf32>
    %51 = arith.addf %49, %50 : vector<8x256xf32>
    %52 = vector.extract_strided_slice %51 {offsets = [0, 0], sizes = [8, 128], strides = [1, 1]} : vector<8x256xf32> to vector<8x128xf32>
    %c8 = arith.constant 8 : index
    %c0_27 = arith.constant 0 : index
    %53 = vector.load %arg12[%c8, %c0_27] : memref<64x128xf32, #tpu.memory_space<vmem>>, vector<8x128xf32>
    %54 = arith.addf %52, %53 : vector<8x128xf32>
    %55 = vector.broadcast %14 : vector<1x128xf32> to vector<8x128xf32>
    %56 = arith.mulf %54, %55 : vector<8x128xf32>
    %57 = math.tanh %56 : vector<8x128xf32>
    %58 = vector.broadcast %14 : vector<1x128xf32> to vector<8x128xf32>
    %59 = arith.mulf %57, %58 : vector<8x128xf32>
    %60 = vector.broadcast %16 : vector<1x128xf32> to vector<8x128xf32>
    %61 = arith.addf %59, %60 : vector<8x128xf32>
    %62 = vector.extract_strided_slice %61 {offsets = [0, 0], sizes = [8, 32], strides = [1, 1]} : vector<8x128xf32> to vector<8x32xf32>
    %63 = vector.extract_strided_slice %61 {offsets = [0, 32], sizes = [8, 32], strides = [1, 1]} : vector<8x128xf32> to vector<8x32xf32>
    %64 = vector.extract_strided_slice %61 {offsets = [0, 64], sizes = [8, 32], strides = [1, 1]} : vector<8x128xf32> to vector<8x32xf32>
    %65 = vector.extract_strided_slice %61 {offsets = [0, 96], sizes = [8, 32], strides = [1, 1]} : vector<8x128xf32> to vector<8x32xf32>
    %66 = arith.mulf %63, %45 : vector<8x32xf32>
    %67 = arith.mulf %62, %64 : vector<8x32xf32>
    %68 = arith.addf %66, %67 : vector<8x32xf32>
    %69 = math.tanh %68 : vector<8x32xf32>
    %70 = arith.mulf %65, %69 : vector<8x32xf32>
    %71 = vector.extract_strided_slice %51 {offsets = [0, 128], sizes = [8, 128], strides = [1, 1]} : vector<8x256xf32> to vector<8x128xf32>
    %72 = vector.broadcast %14 : vector<1x128xf32> to vector<8x128xf32>
    %73 = arith.mulf %71, %72 : vector<8x128xf32>
    %74 = math.tanh %73 : vector<8x128xf32>
    %75 = vector.broadcast %14 : vector<1x128xf32> to vector<8x128xf32>
    %76 = arith.mulf %74, %75 : vector<8x128xf32>
    %77 = vector.broadcast %16 : vector<1x128xf32> to vector<8x128xf32>
    %78 = arith.addf %76, %77 : vector<8x128xf32>
    %79 = vector.extract_strided_slice %78 {offsets = [0, 0], sizes = [8, 32], strides = [1, 1]} : vector<8x128xf32> to vector<8x32xf32>
    %80 = vector.extract_strided_slice %78 {offsets = [0, 32], sizes = [8, 32], strides = [1, 1]} : vector<8x128xf32> to vector<8x32xf32>
    %81 = vector.extract_strided_slice %78 {offsets = [0, 64], sizes = [8, 32], strides = [1, 1]} : vector<8x128xf32> to vector<8x32xf32>
    %82 = vector.extract_strided_slice %78 {offsets = [0, 96], sizes = [8, 32], strides = [1, 1]} : vector<8x128xf32> to vector<8x32xf32>
    %83 = arith.mulf %80, %24 : vector<8x32xf32>
    %84 = arith.mulf %79, %81 : vector<8x32xf32>
    %85 = arith.addf %83, %84 : vector<8x32xf32>
    %86 = math.tanh %85 : vector<8x32xf32>
    %87 = arith.mulf %82, %86 : vector<8x32xf32>
    %c0_28 = arith.constant 0 : index
    %c0_29 = arith.constant 0 : index
    %88 = vector.load %arg13[%c0_28, %c0_29] : memref<64x32xf32, #tpu.memory_space<vmem>>, vector<8x32xf32>
    tpu.vector_store %arg13[%c0_28, %c0_29], %87 {strides = array<i32>} : memref<64x32xf32, #tpu.memory_space<vmem>>, vector<8x32xf32>,
    %89 = tpu.concatenate %70, %87 in 1 : vector<8x32xf32>, vector<8x32xf32> -> vector<8x64xf32>
    %cst_30 = arith.constant dense<0.000000e+00> : vector<8x256xf32>
    %90 = tpu.matmul %89, %4, %cst_30 {dimension_numbers = #tpu.dot_dimension_numbers<[1], [0], [0], [1], [0, 0, 1, 1], [], []>} : vector<8x64xf32>, vector<64x256xf32>, vector<8x256xf32> -> vector<8x256xf32>
    %91 = vector.broadcast %5 : vector<1x256xf32> to vector<8x256xf32>
    %92 = arith.addf %90, %91 : vector<8x256xf32>
    %93 = vector.extract_strided_slice %92 {offsets = [0, 0], sizes = [8, 128], strides = [1, 1]} : vector<8x256xf32> to vector<8x128xf32>
    %c16 = arith.constant 16 : index
    %c0_31 = arith.constant 0 : index
    %94 = vector.load %arg12[%c16, %c0_31] : memref<64x128xf32, #tpu.memory_space<vmem>>, vector<8x128xf32>
    %95 = arith.addf %93, %94 : vector<8x128xf32>
    %96 = vector.broadcast %14 : vector<1x128xf32> to vector<8x128xf32>
    %97 = arith.mulf %95, %96 : vector<8x128xf32>
    %98 = math.tanh %97 : vector<8x128xf32>
    %99 = vector.broadcast %14 : vector<1x128xf32> to vector<8x128xf32>
    %100 = arith.mulf %98, %99 : vector<8x128xf32>
    %101 = vector.broadcast %16 : vector<1x128xf32> to vector<8x128xf32>
    %102 = arith.addf %100, %101 : vector<8x128xf32>
    %103 = vector.extract_strided_slice %102 {offsets = [0, 0], sizes = [8, 32], strides = [1, 1]} : vector<8x128xf32> to vector<8x32xf32>
    %104 = vector.extract_strided_slice %102 {offsets = [0, 32], sizes = [8, 32], strides = [1, 1]} : vector<8x128xf32> to vector<8x32xf32>
    %105 = vector.extract_strided_slice %102 {offsets = [0, 64], sizes = [8, 32], strides = [1, 1]} : vector<8x128xf32> to vector<8x32xf32>
    %106 = vector.extract_strided_slice %102 {offsets = [0, 96], sizes = [8, 32], strides = [1, 1]} : vector<8x128xf32> to vector<8x32xf32>
    %107 = arith.mulf %104, %68 : vector<8x32xf32>
    %108 = arith.mulf %103, %105 : vector<8x32xf32>
    %109 = arith.addf %107, %108 : vector<8x32xf32>
    %110 = math.tanh %109 : vector<8x32xf32>
    %111 = arith.mulf %106, %110 : vector<8x32xf32>
    %112 = vector.extract_strided_slice %92 {offsets = [0, 128], sizes = [8, 128], strides = [1, 1]} : vector<8x256xf32> to vector<8x128xf32>
    %113 = vector.broadcast %14 : vector<1x128xf32> to vector<8x128xf32>
    %114 = arith.mulf %112, %113 : vector<8x128xf32>
    %115 = math.tanh %114 : vector<8x128xf32>
    %116 = vector.broadcast %14 : vector<1x128xf32> to vector<8x128xf32>
    %117 = arith.mulf %115, %116 : vector<8x128xf32>
    %118 = vector.broadcast %16 : vector<1x128xf32> to vector<8x128xf32>
    %119 = arith.addf %117, %118 : vector<8x128xf32>
    %120 = vector.extract_strided_slice %119 {offsets = [0, 0], sizes = [8, 32], strides = [1, 1]} : vector<8x128xf32> to vector<8x32xf32>
    %121 = vector.extract_strided_slice %119 {offsets = [0, 32], sizes = [8, 32], strides = [1, 1]} : vector<8x128xf32> to vector<8x32xf32>
    %122 = vector.extract_strided_slice %119 {offsets = [0, 64], sizes = [8, 32], strides = [1, 1]} : vector<8x128xf32> to vector<8x32xf32>
    %123 = vector.extract_strided_slice %119 {offsets = [0, 96], sizes = [8, 32], strides = [1, 1]} : vector<8x128xf32> to vector<8x32xf32>
    %124 = arith.mulf %121, %85 : vector<8x32xf32>
    %125 = arith.mulf %120, %122 : vector<8x32xf32>
    %126 = arith.addf %124, %125 : vector<8x32xf32>
    %127 = math.tanh %126 : vector<8x32xf32>
    %128 = arith.mulf %123, %127 : vector<8x32xf32>
    %c8_32 = arith.constant 8 : index
    %c0_33 = arith.constant 0 : index
    %129 = vector.load %arg13[%c8_32, %c0_33] : memref<64x32xf32, #tpu.memory_space<vmem>>, vector<8x32xf32>
    tpu.vector_store %arg13[%c8_32, %c0_33], %128 {strides = array<i32>} : memref<64x32xf32, #tpu.memory_space<vmem>>, vector<8x32xf32>,
    %130 = tpu.concatenate %111, %128 in 1 : vector<8x32xf32>, vector<8x32xf32> -> vector<8x64xf32>
    %cst_34 = arith.constant dense<0.000000e+00> : vector<8x256xf32>
    %131 = tpu.matmul %130, %4, %cst_34 {dimension_numbers = #tpu.dot_dimension_numbers<[1], [0], [0], [1], [0, 0, 1, 1], [], []>} : vector<8x64xf32>, vector<64x256xf32>, vector<8x256xf32> -> vector<8x256xf32>
    %132 = vector.broadcast %5 : vector<1x256xf32> to vector<8x256xf32>
    %133 = arith.addf %131, %132 : vector<8x256xf32>
    %134 = vector.extract_strided_slice %133 {offsets = [0, 0], sizes = [8, 128], strides = [1, 1]} : vector<8x256xf32> to vector<8x128xf32>
    %c24 = arith.constant 24 : index
    %c0_35 = arith.constant 0 : index
    %135 = vector.load %arg12[%c24, %c0_35] : memref<64x128xf32, #tpu.memory_space<vmem>>, vector<8x128xf32>
    %136 = arith.addf %134, %135 : vector<8x128xf32>
    %137 = vector.broadcast %14 : vector<1x128xf32> to vector<8x128xf32>
    %138 = arith.mulf %136, %137 : vector<8x128xf32>
    %139 = math.tanh %138 : vector<8x128xf32>
    %140 = vector.broadcast %14 : vector<1x128xf32> to vector<8x128xf32>
    %141 = arith.mulf %139, %140 : vector<8x128xf32>
    %142 = vector.broadcast %16 : vector<1x128xf32> to vector<8x128xf32>
    %143 = arith.addf %141, %142 : vector<8x128xf32>
    %144 = vector.extract_strided_slice %143 {offsets = [0, 0], sizes = [8, 32], strides = [1, 1]} : vector<8x128xf32> to vector<8x32xf32>
    %145 = vector.extract_strided_slice %143 {offsets = [0, 32], sizes = [8, 32], strides = [1, 1]} : vector<8x128xf32> to vector<8x32xf32>
    %146 = vector.extract_strided_slice %143 {offsets = [0, 64], sizes = [8, 32], strides = [1, 1]} : vector<8x128xf32> to vector<8x32xf32>
    %147 = vector.extract_strided_slice %143 {offsets = [0, 96], sizes = [8, 32], strides = [1, 1]} : vector<8x128xf32> to vector<8x32xf32>
    %148 = arith.mulf %145, %109 : vector<8x32xf32>
    %149 = arith.mulf %144, %146 : vector<8x32xf32>
    %150 = arith.addf %148, %149 : vector<8x32xf32>
    %151 = math.tanh %150 : vector<8x32xf32>
    %152 = arith.mulf %147, %151 : vector<8x32xf32>
    %153 = vector.extract_strided_slice %133 {offsets = [0, 128], sizes = [8, 128], strides = [1, 1]} : vector<8x256xf32> to vector<8x128xf32>
    %154 = vector.broadcast %14 : vector<1x128xf32> to vector<8x128xf32>
    %155 = arith.mulf %153, %154 : vector<8x128xf32>
    %156 = math.tanh %155 : vector<8x128xf32>
    %157 = vector.broadcast %14 : vector<1x128xf32> to vector<8x128xf32>
    %158 = arith.mulf %156, %157 : vector<8x128xf32>
    %159 = vector.broadcast %16 : vector<1x128xf32> to vector<8x128xf32>
    %160 = arith.addf %158, %159 : vector<8x128xf32>
    %161 = vector.extract_strided_slice %160 {offsets = [0, 0], sizes = [8, 32], strides = [1, 1]} : vector<8x128xf32> to vector<8x32xf32>
    %162 = vector.extract_strided_slice %160 {offsets = [0, 32], sizes = [8, 32], strides = [1, 1]} : vector<8x128xf32> to vector<8x32xf32>
    %163 = vector.extract_strided_slice %160 {offsets = [0, 64], sizes = [8, 32], strides = [1, 1]} : vector<8x128xf32> to vector<8x32xf32>
    %164 = vector.extract_strided_slice %160 {offsets = [0, 96], sizes = [8, 32], strides = [1, 1]} : vector<8x128xf32> to vector<8x32xf32>
    %165 = arith.mulf %162, %126 : vector<8x32xf32>
    %166 = arith.mulf %161, %163 : vector<8x32xf32>
    %167 = arith.addf %165, %166 : vector<8x32xf32>
    %168 = math.tanh %167 : vector<8x32xf32>
    %169 = arith.mulf %164, %168 : vector<8x32xf32>
    %c16_36 = arith.constant 16 : index
    %c0_37 = arith.constant 0 : index
    %170 = vector.load %arg13[%c16_36, %c0_37] : memref<64x32xf32, #tpu.memory_space<vmem>>, vector<8x32xf32>
    tpu.vector_store %arg13[%c16_36, %c0_37], %169 {strides = array<i32>} : memref<64x32xf32, #tpu.memory_space<vmem>>, vector<8x32xf32>,
    %171 = tpu.concatenate %152, %169 in 1 : vector<8x32xf32>, vector<8x32xf32> -> vector<8x64xf32>
    %cst_38 = arith.constant dense<0.000000e+00> : vector<8x256xf32>
    %172 = tpu.matmul %171, %4, %cst_38 {dimension_numbers = #tpu.dot_dimension_numbers<[1], [0], [0], [1], [0, 0, 1, 1], [], []>} : vector<8x64xf32>, vector<64x256xf32>, vector<8x256xf32> -> vector<8x256xf32>
    %173 = vector.broadcast %5 : vector<1x256xf32> to vector<8x256xf32>
    %174 = arith.addf %172, %173 : vector<8x256xf32>
    %175 = vector.extract_strided_slice %174 {offsets = [0, 0], sizes = [8, 128], strides = [1, 1]} : vector<8x256xf32> to vector<8x128xf32>
    %c32 = arith.constant 32 : index
    %c0_39 = arith.constant 0 : index
    %176 = vector.load %arg12[%c32, %c0_39] : memref<64x128xf32, #tpu.memory_space<vmem>>, vector<8x128xf32>
    %177 = arith.addf %175, %176 : vector<8x128xf32>
    %178 = vector.broadcast %14 : vector<1x128xf32> to vector<8x128xf32>
    %179 = arith.mulf %177, %178 : vector<8x128xf32>
    %180 = math.tanh %179 : vector<8x128xf32>
    %181 = vector.broadcast %14 : vector<1x128xf32> to vector<8x128xf32>
    %182 = arith.mulf %180, %181 : vector<8x128xf32>
    %183 = vector.broadcast %16 : vector<1x128xf32> to vector<8x128xf32>
    %184 = arith.addf %182, %183 : vector<8x128xf32>
    %185 = vector.extract_strided_slice %184 {offsets = [0, 0], sizes = [8, 32], strides = [1, 1]} : vector<8x128xf32> to vector<8x32xf32>
    %186 = vector.extract_strided_slice %184 {offsets = [0, 32], sizes = [8, 32], strides = [1, 1]} : vector<8x128xf32> to vector<8x32xf32>
    %187 = vector.extract_strided_slice %184 {offsets = [0, 64], sizes = [8, 32], strides = [1, 1]} : vector<8x128xf32> to vector<8x32xf32>
    %188 = vector.extract_strided_slice %184 {offsets = [0, 96], sizes = [8, 32], strides = [1, 1]} : vector<8x128xf32> to vector<8x32xf32>
    %189 = arith.mulf %186, %150 : vector<8x32xf32>
    %190 = arith.mulf %185, %187 : vector<8x32xf32>
    %191 = arith.addf %189, %190 : vector<8x32xf32>
    %192 = math.tanh %191 : vector<8x32xf32>
    %193 = arith.mulf %188, %192 : vector<8x32xf32>
    %194 = vector.extract_strided_slice %174 {offsets = [0, 128], sizes = [8, 128], strides = [1, 1]} : vector<8x256xf32> to vector<8x128xf32>
    %195 = vector.broadcast %14 : vector<1x128xf32> to vector<8x128xf32>
    %196 = arith.mulf %194, %195 : vector<8x128xf32>
    %197 = math.tanh %196 : vector<8x128xf32>
    %198 = vector.broadcast %14 : vector<1x128xf32> to vector<8x128xf32>
    %199 = arith.mulf %197, %198 : vector<8x128xf32>
    %200 = vector.broadcast %16 : vector<1x128xf32> to vector<8x128xf32>
    %201 = arith.addf %199, %200 : vector<8x128xf32>
    %202 = vector.extract_strided_slice %201 {offsets = [0, 0], sizes = [8, 32], strides = [1, 1]} : vector<8x128xf32> to vector<8x32xf32>
    %203 = vector.extract_strided_slice %201 {offsets = [0, 32], sizes = [8, 32], strides = [1, 1]} : vector<8x128xf32> to vector<8x32xf32>
    %204 = vector.extract_strided_slice %201 {offsets = [0, 64], sizes = [8, 32], strides = [1, 1]} : vector<8x128xf32> to vector<8x32xf32>
    %205 = vector.extract_strided_slice %201 {offsets = [0, 96], sizes = [8, 32], strides = [1, 1]} : vector<8x128xf32> to vector<8x32xf32>
    %206 = arith.mulf %203, %167 : vector<8x32xf32>
    %207 = arith.mulf %202, %204 : vector<8x32xf32>
    %208 = arith.addf %206, %207 : vector<8x32xf32>
    %209 = math.tanh %208 : vector<8x32xf32>
    %210 = arith.mulf %205, %209 : vector<8x32xf32>
    %c24_40 = arith.constant 24 : index
    %c0_41 = arith.constant 0 : index
    %211 = vector.load %arg13[%c24_40, %c0_41] : memref<64x32xf32, #tpu.memory_space<vmem>>, vector<8x32xf32>
    tpu.vector_store %arg13[%c24_40, %c0_41], %210 {strides = array<i32>} : memref<64x32xf32, #tpu.memory_space<vmem>>, vector<8x32xf32>,
    %212 = tpu.concatenate %193, %210 in 1 : vector<8x32xf32>, vector<8x32xf32> -> vector<8x64xf32>
    %cst_42 = arith.constant dense<0.000000e+00> : vector<8x256xf32>
    %213 = tpu.matmul %212, %4, %cst_42 {dimension_numbers = #tpu.dot_dimension_numbers<[1], [0], [0], [1], [0, 0, 1, 1], [], []>} : vector<8x64xf32>, vector<64x256xf32>, vector<8x256xf32> -> vector<8x256xf32>
    %214 = vector.broadcast %5 : vector<1x256xf32> to vector<8x256xf32>
    %215 = arith.addf %213, %214 : vector<8x256xf32>
    %216 = vector.extract_strided_slice %215 {offsets = [0, 0], sizes = [8, 128], strides = [1, 1]} : vector<8x256xf32> to vector<8x128xf32>
    %c40 = arith.constant 40 : index
    %c0_43 = arith.constant 0 : index
    %217 = vector.load %arg12[%c40, %c0_43] : memref<64x128xf32, #tpu.memory_space<vmem>>, vector<8x128xf32>
    %218 = arith.addf %216, %217 : vector<8x128xf32>
    %219 = vector.broadcast %14 : vector<1x128xf32> to vector<8x128xf32>
    %220 = arith.mulf %218, %219 : vector<8x128xf32>
    %221 = math.tanh %220 : vector<8x128xf32>
    %222 = vector.broadcast %14 : vector<1x128xf32> to vector<8x128xf32>
    %223 = arith.mulf %221, %222 : vector<8x128xf32>
    %224 = vector.broadcast %16 : vector<1x128xf32> to vector<8x128xf32>
    %225 = arith.addf %223, %224 : vector<8x128xf32>
    %226 = vector.extract_strided_slice %225 {offsets = [0, 0], sizes = [8, 32], strides = [1, 1]} : vector<8x128xf32> to vector<8x32xf32>
    %227 = vector.extract_strided_slice %225 {offsets = [0, 32], sizes = [8, 32], strides = [1, 1]} : vector<8x128xf32> to vector<8x32xf32>
    %228 = vector.extract_strided_slice %225 {offsets = [0, 64], sizes = [8, 32], strides = [1, 1]} : vector<8x128xf32> to vector<8x32xf32>
    %229 = vector.extract_strided_slice %225 {offsets = [0, 96], sizes = [8, 32], strides = [1, 1]} : vector<8x128xf32> to vector<8x32xf32>
    %230 = arith.mulf %227, %191 : vector<8x32xf32>
    %231 = arith.mulf %226, %228 : vector<8x32xf32>
    %232 = arith.addf %230, %231 : vector<8x32xf32>
    %233 = math.tanh %232 : vector<8x32xf32>
    %234 = arith.mulf %229, %233 : vector<8x32xf32>
    %235 = vector.extract_strided_slice %215 {offsets = [0, 128], sizes = [8, 128], strides = [1, 1]} : vector<8x256xf32> to vector<8x128xf32>
    %236 = vector.broadcast %14 : vector<1x128xf32> to vector<8x128xf32>
    %237 = arith.mulf %235, %236 : vector<8x128xf32>
    %238 = math.tanh %237 : vector<8x128xf32>
    %239 = vector.broadcast %14 : vector<1x128xf32> to vector<8x128xf32>
    %240 = arith.mulf %238, %239 : vector<8x128xf32>
    %241 = vector.broadcast %16 : vector<1x128xf32> to vector<8x128xf32>
    %242 = arith.addf %240, %241 : vector<8x128xf32>
    %243 = vector.extract_strided_slice %242 {offsets = [0, 0], sizes = [8, 32], strides = [1, 1]} : vector<8x128xf32> to vector<8x32xf32>
    %244 = vector.extract_strided_slice %242 {offsets = [0, 32], sizes = [8, 32], strides = [1, 1]} : vector<8x128xf32> to vector<8x32xf32>
    %245 = vector.extract_strided_slice %242 {offsets = [0, 64], sizes = [8, 32], strides = [1, 1]} : vector<8x128xf32> to vector<8x32xf32>
    %246 = vector.extract_strided_slice %242 {offsets = [0, 96], sizes = [8, 32], strides = [1, 1]} : vector<8x128xf32> to vector<8x32xf32>
    %247 = arith.mulf %244, %208 : vector<8x32xf32>
    %248 = arith.mulf %243, %245 : vector<8x32xf32>
    %249 = arith.addf %247, %248 : vector<8x32xf32>
    %250 = math.tanh %249 : vector<8x32xf32>
    %251 = arith.mulf %246, %250 : vector<8x32xf32>
    %c32_44 = arith.constant 32 : index
    %c0_45 = arith.constant 0 : index
    %252 = vector.load %arg13[%c32_44, %c0_45] : memref<64x32xf32, #tpu.memory_space<vmem>>, vector<8x32xf32>
    tpu.vector_store %arg13[%c32_44, %c0_45], %251 {strides = array<i32>} : memref<64x32xf32, #tpu.memory_space<vmem>>, vector<8x32xf32>,
    %253 = tpu.concatenate %234, %251 in 1 : vector<8x32xf32>, vector<8x32xf32> -> vector<8x64xf32>
    %cst_46 = arith.constant dense<0.000000e+00> : vector<8x256xf32>
    %254 = tpu.matmul %253, %4, %cst_46 {dimension_numbers = #tpu.dot_dimension_numbers<[1], [0], [0], [1], [0, 0, 1, 1], [], []>} : vector<8x64xf32>, vector<64x256xf32>, vector<8x256xf32> -> vector<8x256xf32>
    %255 = vector.broadcast %5 : vector<1x256xf32> to vector<8x256xf32>
    %256 = arith.addf %254, %255 : vector<8x256xf32>
    %257 = vector.extract_strided_slice %256 {offsets = [0, 0], sizes = [8, 128], strides = [1, 1]} : vector<8x256xf32> to vector<8x128xf32>
    %c48 = arith.constant 48 : index
    %c0_47 = arith.constant 0 : index
    %258 = vector.load %arg12[%c48, %c0_47] : memref<64x128xf32, #tpu.memory_space<vmem>>, vector<8x128xf32>
    %259 = arith.addf %257, %258 : vector<8x128xf32>
    %260 = vector.broadcast %14 : vector<1x128xf32> to vector<8x128xf32>
    %261 = arith.mulf %259, %260 : vector<8x128xf32>
    %262 = math.tanh %261 : vector<8x128xf32>
    %263 = vector.broadcast %14 : vector<1x128xf32> to vector<8x128xf32>
    %264 = arith.mulf %262, %263 : vector<8x128xf32>
    %265 = vector.broadcast %16 : vector<1x128xf32> to vector<8x128xf32>
    %266 = arith.addf %264, %265 : vector<8x128xf32>
    %267 = vector.extract_strided_slice %266 {offsets = [0, 0], sizes = [8, 32], strides = [1, 1]} : vector<8x128xf32> to vector<8x32xf32>
    %268 = vector.extract_strided_slice %266 {offsets = [0, 32], sizes = [8, 32], strides = [1, 1]} : vector<8x128xf32> to vector<8x32xf32>
    %269 = vector.extract_strided_slice %266 {offsets = [0, 64], sizes = [8, 32], strides = [1, 1]} : vector<8x128xf32> to vector<8x32xf32>
    %270 = vector.extract_strided_slice %266 {offsets = [0, 96], sizes = [8, 32], strides = [1, 1]} : vector<8x128xf32> to vector<8x32xf32>
    %271 = arith.mulf %268, %232 : vector<8x32xf32>
    %272 = arith.mulf %267, %269 : vector<8x32xf32>
    %273 = arith.addf %271, %272 : vector<8x32xf32>
    %274 = math.tanh %273 : vector<8x32xf32>
    %275 = arith.mulf %270, %274 : vector<8x32xf32>
    %276 = vector.extract_strided_slice %256 {offsets = [0, 128], sizes = [8, 128], strides = [1, 1]} : vector<8x256xf32> to vector<8x128xf32>
    %277 = vector.broadcast %14 : vector<1x128xf32> to vector<8x128xf32>
    %278 = arith.mulf %276, %277 : vector<8x128xf32>
    %279 = math.tanh %278 : vector<8x128xf32>
    %280 = vector.broadcast %14 : vector<1x128xf32> to vector<8x128xf32>
    %281 = arith.mulf %279, %280 : vector<8x128xf32>
    %282 = vector.broadcast %16 : vector<1x128xf32> to vector<8x128xf32>
    %283 = arith.addf %281, %282 : vector<8x128xf32>
    %284 = vector.extract_strided_slice %283 {offsets = [0, 0], sizes = [8, 32], strides = [1, 1]} : vector<8x128xf32> to vector<8x32xf32>
    %285 = vector.extract_strided_slice %283 {offsets = [0, 32], sizes = [8, 32], strides = [1, 1]} : vector<8x128xf32> to vector<8x32xf32>
    %286 = vector.extract_strided_slice %283 {offsets = [0, 64], sizes = [8, 32], strides = [1, 1]} : vector<8x128xf32> to vector<8x32xf32>
    %287 = vector.extract_strided_slice %283 {offsets = [0, 96], sizes = [8, 32], strides = [1, 1]} : vector<8x128xf32> to vector<8x32xf32>
    %288 = arith.mulf %285, %249 : vector<8x32xf32>
    %289 = arith.mulf %284, %286 : vector<8x32xf32>
    %290 = arith.addf %288, %289 : vector<8x32xf32>
    %291 = math.tanh %290 : vector<8x32xf32>
    %292 = arith.mulf %287, %291 : vector<8x32xf32>
    %c40_48 = arith.constant 40 : index
    %c0_49 = arith.constant 0 : index
    %293 = vector.load %arg13[%c40_48, %c0_49] : memref<64x32xf32, #tpu.memory_space<vmem>>, vector<8x32xf32>
    tpu.vector_store %arg13[%c40_48, %c0_49], %292 {strides = array<i32>} : memref<64x32xf32, #tpu.memory_space<vmem>>, vector<8x32xf32>,
    %294 = tpu.concatenate %275, %292 in 1 : vector<8x32xf32>, vector<8x32xf32> -> vector<8x64xf32>
    %cst_50 = arith.constant dense<0.000000e+00> : vector<8x256xf32>
    %295 = tpu.matmul %294, %4, %cst_50 {dimension_numbers = #tpu.dot_dimension_numbers<[1], [0], [0], [1], [0, 0, 1, 1], [], []>} : vector<8x64xf32>, vector<64x256xf32>, vector<8x256xf32> -> vector<8x256xf32>
    %296 = vector.broadcast %5 : vector<1x256xf32> to vector<8x256xf32>
    %297 = arith.addf %295, %296 : vector<8x256xf32>
    %298 = vector.extract_strided_slice %297 {offsets = [0, 0], sizes = [8, 128], strides = [1, 1]} : vector<8x256xf32> to vector<8x128xf32>
    %c56 = arith.constant 56 : index
    %c0_51 = arith.constant 0 : index
    %299 = vector.load %arg12[%c56, %c0_51] : memref<64x128xf32, #tpu.memory_space<vmem>>, vector<8x128xf32>
    %300 = arith.addf %298, %299 : vector<8x128xf32>
    %301 = vector.broadcast %14 : vector<1x128xf32> to vector<8x128xf32>
    %302 = arith.mulf %300, %301 : vector<8x128xf32>
    %303 = math.tanh %302 : vector<8x128xf32>
    %304 = vector.broadcast %14 : vector<1x128xf32> to vector<8x128xf32>
    %305 = arith.mulf %303, %304 : vector<8x128xf32>
    %306 = vector.broadcast %16 : vector<1x128xf32> to vector<8x128xf32>
    %307 = arith.addf %305, %306 : vector<8x128xf32>
    %308 = vector.extract_strided_slice %307 {offsets = [0, 0], sizes = [8, 32], strides = [1, 1]} : vector<8x128xf32> to vector<8x32xf32>
    %309 = vector.extract_strided_slice %307 {offsets = [0, 32], sizes = [8, 32], strides = [1, 1]} : vector<8x128xf32> to vector<8x32xf32>
    %310 = vector.extract_strided_slice %307 {offsets = [0, 64], sizes = [8, 32], strides = [1, 1]} : vector<8x128xf32> to vector<8x32xf32>
    %311 = vector.extract_strided_slice %307 {offsets = [0, 96], sizes = [8, 32], strides = [1, 1]} : vector<8x128xf32> to vector<8x32xf32>
    %312 = arith.mulf %309, %273 : vector<8x32xf32>
    %313 = arith.mulf %308, %310 : vector<8x32xf32>
    %314 = arith.addf %312, %313 : vector<8x32xf32>
    %315 = math.tanh %314 : vector<8x32xf32>
    %316 = arith.mulf %311, %315 : vector<8x32xf32>
    %317 = vector.extract_strided_slice %297 {offsets = [0, 128], sizes = [8, 128], strides = [1, 1]} : vector<8x256xf32> to vector<8x128xf32>
    %318 = vector.broadcast %14 : vector<1x128xf32> to vector<8x128xf32>
    %319 = arith.mulf %317, %318 : vector<8x128xf32>
    %320 = math.tanh %319 : vector<8x128xf32>
    %321 = vector.broadcast %14 : vector<1x128xf32> to vector<8x128xf32>
    %322 = arith.mulf %320, %321 : vector<8x128xf32>
    %323 = vector.broadcast %16 : vector<1x128xf32> to vector<8x128xf32>
    %324 = arith.addf %322, %323 : vector<8x128xf32>
    %325 = vector.extract_strided_slice %324 {offsets = [0, 0], sizes = [8, 32], strides = [1, 1]} : vector<8x128xf32> to vector<8x32xf32>
    %326 = vector.extract_strided_slice %324 {offsets = [0, 32], sizes = [8, 32], strides = [1, 1]} : vector<8x128xf32> to vector<8x32xf32>
    %327 = vector.extract_strided_slice %324 {offsets = [0, 64], sizes = [8, 32], strides = [1, 1]} : vector<8x128xf32> to vector<8x32xf32>
    %328 = vector.extract_strided_slice %324 {offsets = [0, 96], sizes = [8, 32], strides = [1, 1]} : vector<8x128xf32> to vector<8x32xf32>
    %329 = arith.mulf %326, %290 : vector<8x32xf32>
    %330 = arith.mulf %325, %327 : vector<8x32xf32>
    %331 = arith.addf %329, %330 : vector<8x32xf32>
    %332 = math.tanh %331 : vector<8x32xf32>
    %333 = arith.mulf %328, %332 : vector<8x32xf32>
    %c48_52 = arith.constant 48 : index
    %c0_53 = arith.constant 0 : index
    %334 = vector.load %arg13[%c48_52, %c0_53] : memref<64x32xf32, #tpu.memory_space<vmem>>, vector<8x32xf32>
    tpu.vector_store %arg13[%c48_52, %c0_53], %333 {strides = array<i32>} : memref<64x32xf32, #tpu.memory_space<vmem>>, vector<8x32xf32>,
    %335 = tpu.concatenate %316, %333 in 1 : vector<8x32xf32>, vector<8x32xf32> -> vector<8x64xf32>
    %cst_54 = arith.constant dense<0.000000e+00> : vector<8x256xf32>
    %336 = tpu.matmul %335, %4, %cst_54 {dimension_numbers = #tpu.dot_dimension_numbers<[1], [0], [0], [1], [0, 0, 1, 1], [], []>} : vector<8x64xf32>, vector<64x256xf32>, vector<8x256xf32> -> vector<8x256xf32>
    %337 = vector.broadcast %5 : vector<1x256xf32> to vector<8x256xf32>
    %338 = arith.addf %336, %337 : vector<8x256xf32>
    %339 = vector.extract_strided_slice %338 {offsets = [0, 128], sizes = [8, 128], strides = [1, 1]} : vector<8x256xf32> to vector<8x128xf32>
    %340 = vector.broadcast %14 : vector<1x128xf32> to vector<8x128xf32>
    %341 = arith.mulf %339, %340 : vector<8x128xf32>
    %342 = math.tanh %341 : vector<8x128xf32>
    %343 = vector.broadcast %14 : vector<1x128xf32> to vector<8x128xf32>
    %344 = arith.mulf %342, %343 : vector<8x128xf32>
    %345 = vector.broadcast %16 : vector<1x128xf32> to vector<8x128xf32>
    %346 = arith.addf %344, %345 : vector<8x128xf32>
    %347 = vector.extract_strided_slice %346 {offsets = [0, 0], sizes = [8, 32], strides = [1, 1]} : vector<8x128xf32> to vector<8x32xf32>
    %348 = vector.extract_strided_slice %346 {offsets = [0, 32], sizes = [8, 32], strides = [1, 1]} : vector<8x128xf32> to vector<8x32xf32>
    %349 = vector.extract_strided_slice %346 {offsets = [0, 64], sizes = [8, 32], strides = [1, 1]} : vector<8x128xf32> to vector<8x32xf32>
    %350 = vector.extract_strided_slice %346 {offsets = [0, 96], sizes = [8, 32], strides = [1, 1]} : vector<8x128xf32> to vector<8x32xf32>
    %351 = arith.mulf %348, %331 : vector<8x32xf32>
    %352 = arith.mulf %347, %349 : vector<8x32xf32>
    %353 = arith.addf %351, %352 : vector<8x32xf32>
    %354 = math.tanh %353 : vector<8x32xf32>
    %355 = arith.mulf %350, %354 : vector<8x32xf32>
    %c56_55 = arith.constant 56 : index
    %c0_56 = arith.constant 0 : index
    %356 = vector.load %arg13[%c56_55, %c0_56] : memref<64x32xf32, #tpu.memory_space<vmem>>, vector<8x32xf32>
    tpu.vector_store %arg13[%c56_55, %c0_56], %355 {strides = array<i32>} : memref<64x32xf32, #tpu.memory_space<vmem>>, vector<8x32xf32>,
    %c0_57 = arith.constant 0 : index
    %c0_58 = arith.constant 0 : index
    %c0_59 = arith.constant 0 : index
    %357 = vector.load %arg10[%c0_57, %c0_58, %c0_59] : memref<2x8x32xf32, #tpu.memory_space<vmem>>, vector<1x8x32xf32>
    %358 = vector.shape_cast %357 : vector<1x8x32xf32> to vector<8x32xf32>
    %359 = vector.shape_cast %316 : vector<8x32xf32> to vector<1x8x32xf32>
    tpu.vector_store %arg10[%c0_57, %c0_58, %c0_59], %359 {strides = array<i32>} : memref<2x8x32xf32, #tpu.memory_space<vmem>>, vector<1x8x32xf32>,
    %c0_60 = arith.constant 0 : index
    %c0_61 = arith.constant 0 : index
    %c0_62 = arith.constant 0 : index
    %360 = vector.load %arg11[%c0_60, %c0_61, %c0_62] : memref<2x8x32xf32, #tpu.memory_space<vmem>>, vector<1x8x32xf32>
    %361 = vector.shape_cast %360 : vector<1x8x32xf32> to vector<8x32xf32>
    %362 = vector.shape_cast %314 : vector<8x32xf32> to vector<1x8x32xf32>
    tpu.vector_store %arg11[%c0_60, %c0_61, %c0_62], %362 {strides = array<i32>} : memref<2x8x32xf32, #tpu.memory_space<vmem>>, vector<1x8x32xf32>,
    %c1_63 = arith.constant 1 : index
    %c0_64 = arith.constant 0 : index
    %c0_65 = arith.constant 0 : index
    %363 = vector.load %arg10[%c1_63, %c0_64, %c0_65] : memref<2x8x32xf32, #tpu.memory_space<vmem>>, vector<1x8x32xf32>
    %364 = vector.shape_cast %363 : vector<1x8x32xf32> to vector<8x32xf32>
    %365 = vector.shape_cast %355 : vector<8x32xf32> to vector<1x8x32xf32>
    tpu.vector_store %arg10[%c1_63, %c0_64, %c0_65], %365 {strides = array<i32>} : memref<2x8x32xf32, #tpu.memory_space<vmem>>, vector<1x8x32xf32>,
    %c1_66 = arith.constant 1 : index
    %c0_67 = arith.constant 0 : index
    %c0_68 = arith.constant 0 : index
    %366 = vector.load %arg11[%c1_66, %c0_67, %c0_68] : memref<2x8x32xf32, #tpu.memory_space<vmem>>, vector<1x8x32xf32>
    %367 = vector.shape_cast %366 : vector<1x8x32xf32> to vector<8x32xf32>
    %368 = vector.shape_cast %353 : vector<8x32xf32> to vector<1x8x32xf32>
    tpu.vector_store %arg11[%c1_66, %c0_67, %c0_68], %368 {strides = array<i32>} : memref<2x8x32xf32, #tpu.memory_space<vmem>>, vector<1x8x32xf32>,
    %c0_69 = arith.constant 0 : index
    %c0_70 = arith.constant 0 : index
    %369 = vector.load %arg13[%c0_69, %c0_70] : memref<64x32xf32, #tpu.memory_space<vmem>>, vector<64x32xf32>
    %c0_71 = arith.constant 0 : index
    %c0_72 = arith.constant 0 : index
    %370 = vector.load %arg7[%c0_71, %c0_72] : memref<32x8xf32, #tpu.memory_space<vmem>>, vector<32x8xf32>
    %cst_73 = arith.constant dense<0.000000e+00> : vector<64x8xf32>
    %371 = tpu.matmul %369, %370, %cst_73 {dimension_numbers = #tpu.dot_dimension_numbers<[1], [0], [0], [1], [0, 0, 1, 1], [], []>} : vector<64x32xf32>, vector<32x8xf32>, vector<64x8xf32> -> vector<64x8xf32>
    %c0_74 = arith.constant 0 : index
    %c0_75 = arith.constant 0 : index
    %372 = vector.load %arg8[%c0_74, %c0_75] : memref<1x8xf32, #tpu.memory_space<vmem>>, vector<1x8xf32>
    %373 = vector.broadcast %372 : vector<1x8xf32> to vector<64x8xf32>
    %374 = arith.addf %371, %373 : vector<64x8xf32>
    %c0_76 = arith.constant 0 : index
    %c0_77 = arith.constant 0 : index
    %375 = vector.load %arg9[%c0_76, %c0_77] : memref<64x8xf32, #tpu.memory_space<vmem>>, vector<64x8xf32>
    tpu.vector_store %arg9[%c0_76, %c0_77], %374 {strides = array<i32>} : memref<64x8xf32, #tpu.memory_space<vmem>>, vector<64x8xf32>,
    return
  }
  func.func @transform_0(%arg0: i32) -> (i32, i32) {
    %c0_i32 = arith.constant 0 : i32
    %c0_i32_0 = arith.constant 0 : i32
    %c0_i32_1 = arith.constant 0 : i32
    return %c0_i32, %c0_i32_0 : i32, i32
  }
  func.func @transform_1(%arg0: i32) -> (i32, i32, i32) {
    %c0_i32 = arith.constant 0 : i32
    %c0_i32_0 = arith.constant 0 : i32
    %c0_i32_1 = arith.constant 0 : i32
    %c0_i32_2 = arith.constant 0 : i32
    return %c0_i32, %c0_i32_0, %c0_i32_1 : i32, i32, i32
  }
  func.func @transform_2(%arg0: i32) -> (i32, i32, i32) {
    %c0_i32 = arith.constant 0 : i32
    %c0_i32_0 = arith.constant 0 : i32
    %c0_i32_1 = arith.constant 0 : i32
    %c0_i32_2 = arith.constant 0 : i32
    return %c0_i32, %c0_i32_0, %c0_i32_1 : i32, i32, i32
  }
  func.func @transform_3(%arg0: i32) -> (i32, i32) {
    %c0_i32 = arith.constant 0 : i32
    %c0_i32_0 = arith.constant 0 : i32
    %c0_i32_1 = arith.constant 0 : i32
    return %c0_i32, %c0_i32_0 : i32, i32
  }
  func.func @transform_4(%arg0: i32) -> (i32, i32) {
    %c0_i32 = arith.constant 0 : i32
    %c0_i32_0 = arith.constant 0 : i32
    %c0_i32_1 = arith.constant 0 : i32
    return %c0_i32, %c0_i32_0 : i32, i32
  }
  func.func @transform_5(%arg0: i32) -> (i32, i32) {
    %c0_i32 = arith.constant 0 : i32
    %c0_i32_0 = arith.constant 0 : i32
    %c0_i32_1 = arith.constant 0 : i32
    return %c0_i32, %c0_i32_0 : i32, i32
  }
  func.func @transform_6(%arg0: i32) -> (i32, i32) {
    %c0_i32 = arith.constant 0 : i32
    %c0_i32_0 = arith.constant 0 : i32
    %c0_i32_1 = arith.constant 0 : i32
    return %c0_i32, %c0_i32_0 : i32, i32
  }
  func.func @transform_7(%arg0: i32) -> (i32, i32) {
    %c0_i32 = arith.constant 0 : i32
    %c0_i32_0 = arith.constant 0 : i32
    %c0_i32_1 = arith.constant 0 : i32
    return %c0_i32, %c0_i32_0 : i32, i32
  }
  func.func @transform_8(%arg0: i32) -> (i32, i32) {
    %c0_i32 = arith.constant 0 : i32
    %c0_i32_0 = arith.constant 0 : i32
    %c0_i32_1 = arith.constant 0 : i32
    return %c0_i32, %c0_i32_0 : i32, i32
  }
  func.func @transform_9(%arg0: i32) -> (i32, i32, i32) {
    %c0_i32 = arith.constant 0 : i32
    %c0_i32_0 = arith.constant 0 : i32
    %c0_i32_1 = arith.constant 0 : i32
    %c0_i32_2 = arith.constant 0 : i32
    return %c0_i32, %c0_i32_0, %c0_i32_1 : i32, i32, i32
  }
  func.func @transform_10(%arg0: i32) -> (i32, i32, i32) {
    %c0_i32 = arith.constant 0 : i32
    %c0_i32_0 = arith.constant 0 : i32
    %c0_i32_1 = arith.constant 0 : i32
    %c0_i32_2 = arith.constant 0 : i32
    return %c0_i32, %c0_i32_0, %c0_i32_1 : i32, i32, i32
  }
}

</mosaic_0001>

<bundles_post_ra>
// kernel: lstm_module_forward.1
= control target key start
LH: loop header
LB: loop body
LE: loop exit
PB: predicated region body
PF: predicated region fallthrough
CT: control target
= control target key end

     0   :  { %vm42_vm0 = vcmask 130048   ;;  %v1849_v2 = vmov 0.0   ;;  %s1850_s17 = smov 32   ;;  %vm214_vm1 = vcmask 261120   ;;  %vm227_vm2 = vcmask 523264   ;;  %s1853_s13 = smov 96   ;;  %s2398_s1 = inlined_call_operand.vmem [shape: f32[2,8,32], index: 1, kind: input, shape index: {}]   ;;  %s2399_s3 = inlined_call_operand.vmem [shape: f32[16,128], index: 3, kind: input, shape index: {}]   ;;  %s2400_s0 = inlined_call_operand.vmem [shape: f32[64,16], index: 0, kind: input, shape index: {}]   ;;  %s2401_s4 = inlined_call_operand.vmem [shape: f32[64,256], index: 4, kind: input, shape index: {}]   ;;  %s2402_s2 = inlined_call_operand.vmem [shape: f32[2,8,32], index: 2, kind: input, shape index: {}]   ;;  %s2403_s5 = inlined_call_operand.vmem [shape: f32[1,256], index: 5, kind: input, shape index: {}]   ;;  %s2404_s9 = inlined_call_operand.vmem [shape: f32[2,8,32], index: 9, kind: output, shape index: {1}]   ;;  %s2405_s6 = inlined_call_operand.vmem [shape: f32[32,8], index: 6, kind: input, shape index: {}]   ;;  %s2406_s10 = inlined_call_operand.vmem [shape: f32[2,8,32], index: 10, kind: output, shape index: {2}]   ;;  %s2407_s7 = inlined_call_operand.vmem [shape: f32[1,8], index: 7, kind: input, shape index: {}]   ;;  %s2408_s8 = inlined_call_operand.vmem [shape: f32[64,8], index: 8, kind: output, shape index: {0}]  }
   0x1   :  { %v1544_v0 = vld [vmem:[%s2398_s1 + $0x8] sm:$0xff]  ;;  %v40_v1 = vld [vmem:[%s2399_s3] sm:$0xff]  ;;  %400 = vmatprep.mubr.f32.mxu0 %v1849_v2  ;;  %v183_v7 = vld [vmem:[%s2401_s4 + $0x18] sm:$0xff]  ;;  %v197_v49 = vlaneseq  ;;  %v1851_v58 = vmov 0.5   ;;  %vm1515_vm6 = vcmask 64512  }
   0x2   :  { %211 = vrot.lane.b32.xlu0 %v1544_v0, %s1850_s17  ;;  %v41_v3 = vld [vmem:[%s2399_s3 + $0x8] sm:$0xff]  ;;  %v32_v4 = vld [vmem:[%s2400_s0] sm:$0xff]  ;;  %v182_v10 = vld [vmem:[%s2401_s4 + $0x10] sm:$0xff] }
   0x3   :  { %v1624_v5 = vpack.c.bf16 %v41_v3, %v40_v1  ;;  %1592 = vmatprep.mubr.msk.f32.mxu1 %vm42_vm0, %v32_v4  ;;  %v181_v6 = vld [vmem:[%s2401_s4 + $0x8] sm:$0xff]  ;;  %v180_v8 = vld [vmem:[%s2401_s4] sm:$0xff]  ;;  %v187_v13 = vld [vmem:[%s2401_s4 + $0x38] sm:$0xff]  ;;  %v218_v50 = vshrl.u32 %v197_v49, 7  ;;  %v198_v51 = vand.u32 127, %v197_v49 }
   0x4   :  { %v1933_v9 = vpack.c.bf16 %v183_v7, %v181_v6  ;;  %v1938_v11 = vpack.c.bf16 %v182_v10, %v180_v8  ;;  %v185_v12 = vld [vmem:[%s2401_s4 + $0x28] sm:$0xff]  ;;  %v34_v16 = vld [vmem:[%s2400_s0 + $0x10] sm:$0xff]  ;;  %v184_v17 = vld [vmem:[%s2401_s4 + $0x20] sm:$0xff] }
   0x5   :  { %1625 = vmatprep.subr.bf16.mxu1 %v1624_v5  ;;  %v33_v14 = vld [vmem:[%s2400_s0 + $0x8] sm:$0xff]  ;;  %v1949_v15 = vpack.c.bf16 %v187_v13, %v185_v12  ;;  %v186_v18 = vld [vmem:[%s2401_s4 + $0x30] sm:$0xff]  ;;  %v191_v20 = vld [vmem:[%s2401_s4 + $0x58] sm:$0xff]  ;;  %v219_v52 = vsub.s32 0, %v218_v50  ;;  %vm199_vm3 = vcmp.ge.s32.totalorder %v198_v51, 64  ;;  %vm200_vm4 = vcmp.lt.s32.totalorder %v198_v51, 96 }
   0x6   :  { %1627 = vmatpush3.bf16.msra.mxu1 %v1624_v5  ;;  %1645 = vmatprep.subr.bf16.mxu0 %v1933_v9  ;;  %v189_v19 = vld [vmem:[%s2401_s4 + $0x48] sm:$0xff]  ;;  %v35_v21 = vld [vmem:[%s2400_s0 + $0x18] sm:$0xff]  ;;  %v1976_v22 = vpack.c.bf16 %v186_v18, %v184_v17  ;;  %v207_v23 = vld [vmem:[%s2402_s2] sm:$0xff]  ;;  %v223_v17 = vsub.s32 1, %v218_v50 }
   0x7   :  { %1629 = vmatprep.subr.bf16.mxu1 %v1933_v9  ;;  %1647 = vmatpush1.bf16.msra.mxu0 %v1938_v11  ;;  %v36_v24 = vld [vmem:[%s2400_s0 + $0x20] sm:$0xff]  ;;  %v1985_v25 = vpack.c.bf16 %v191_v20, %v189_v19  ;;  %v190_v27 = vld [vmem:[%s2401_s4 + $0x50] sm:$0xff]  ;;  %v193_v28 = vld [vmem:[%s2401_s4 + $0x68] sm:$0xff] }
   0x8   :  { %1649 = vmatprep.subr.bf16.mxu0 %v1949_v15  ;;  %v188_v26 = vld [vmem:[%s2401_s4 + $0x40] sm:$0xff]  ;;  %308 = vrot.lane.b32.xlu1 %v207_v23, %s1850_s17  ;;  %v195_v29 = vld [vmem:[%s2401_s4 + $0x78] sm:$0xff]  ;;  %v37_v30 = vld [vmem:[%s2400_s0 + $0x28] sm:$0xff] }
   0x9   :  { %1593 = vmatmul.mubr.msk.f32.vlgmr.msra.gmra.mrb[0].mxu1 %vm42_vm0, %v33_v14  ;;  %v2008_v31 = vpack.c.bf16 %v190_v27, %v188_v26  ;;  %v38_v32 = vld [vmem:[%s2400_s0 + $0x30] sm:$0xff]  ;;  %v2014_v33 = vpack.c.bf16 %v195_v29, %v193_v28  ;;  %v192_v34 = vld [vmem:[%s2401_s4 + $0x60] sm:$0xff]  ;;  %v39_v36 = vld [vmem:[%s2400_s0 + $0x38] sm:$0xff] }
   0xa   :  { %1631 = vmatpush1.bf16.msra.mxu1 %v1938_v11  ;;  %1595 = vmatprep.mubr.msk.f32.mxu1 %vm42_vm0, %v34_v16  ;;  %v194_v35 = vld [vmem:[%s2401_s4 + $0x70] sm:$0xff]  ;;  %v204_v38 = vld [vmem:[%s2398_s1] sm:$0xff]  ;;  %vm201_vm5 = vmand %vm199_vm3, %vm200_vm4 }
   0xb   :  { %1633 = vmatprep.subr.bf16.mxu1 %v1949_v15  ;;  %1651 = vmatpush1.bf16.msra.mxu0 %v1976_v22  ;;  %v2030_v37 = vpack.c.bf16 %v194_v35, %v192_v34  ;;  %v196_v53 = vld [vmem:[%s2403_s5] sm:$0x3]  ;;  %v2073_v59 = vsel %vm201_vm5, 1.0, %v1851_v58  ;;  %s1852_s5 = smov 64  }
   0xc   :  { %1653 = vmatprep.subr.bf16.mxu0 %v1985_v25  ;;  %v2070_v54 = vrot.slane %v196_v53, %v219_v52  ;;  %v2077_v62 = vsub.f32 1.0, %v2073_v59  ;;  %v2096_v18 = vrot.slane %v196_v53, %v223_v17 }
   0xd   :  { %1596 = vmatmul.mubr.msk.f32.gmra.mrb[2].mxu1 %vm42_vm0, %v35_v21 }
   0xe   :  { %1635 = vmatpush1.bf16.msra.mxu1 %v1976_v22  ;;  %1598 = vmatprep.mubr.msk.f32.mxu1 %vm42_vm0, %v36_v24 }
   0xf   :  { %1637 = vmatprep.subr.bf16.mxu1 %v1985_v25  ;;  %1655 = vmatpush1.bf16.msra.mxu0 %v2008_v31 }
  0x10   :  { %1657 = vmatprep.subr.bf16.mxu0 %v2014_v33 }
  0x11   :  { %1599 = vmatmul.mubr.msk.f32.gmra.mrb[4].mxu1 %vm42_vm0, %v37_v30 }
  0x12   :  { %1639 = vmatpush1.bf16.msra.mxu1 %v2008_v31  ;;  %1601 = vmatprep.mubr.msk.f32.mxu1 %vm42_vm0, %v38_v32 }
  0x13   :  { %1641 = vmatprep.subr.bf16.mxu1 %v2014_v33  ;;  %1659 = vmatpush1.bf16.msra.mxu0 %v2030_v37 }
  0x14   :  { %1677 = vmatprep.subr.bf16.mxu0 %v1933_v9 }
  0x15   :  { %1602 = vmatmul.mubr.msk.f32.gmra.mrb[6].mxu1 %vm42_vm0, %v39_v36  ;;  %v1545_v36 = vld [vmem:[%s2402_s2 + $0x8] sm:$0xff] }
  0x16   :  { %1643 = vmatpush1.bf16.msra.mxu1 %v2030_v37  ;;  %295 = vmatprep.mubr.f32.mxu1 %v1849_v2 }
  0x17   :  { %1661 = vmatprep.subr.bf16.mxu1 %v1933_v9 }
  0x74   :  { %v212_v39 = vpop.permute.xlu0 %211 }
  0x75   :  { %v215_v40 = vsel %vm214_vm1, %v204_v38, %v212_v39 }
  0x76   :  { %1546 = vmatmul.mubr.msk.f32.vlgmr.msra.gmra.mrb[8].mxu1 %vm227_vm2, %v215_v40 }
  0x77   :  { %1663 = vmatpush1.bf16.msra.mxu1 %v1938_v11  ;;  %535 = vmatprep.mubr.f32.mxu1 %v1849_v2 }
  0x78   :  { %1665 = vmatprep.subr.bf16.mxu1 %v1949_v15 }
  0x7a   :  { %v309_v5 = vpop.permute.xlu1 %308 }
  0x7b   :  { %1667 = vmatpush1.bf16.msra.mxu1 %v1976_v22 }
  0x7c   :  { %1669 = vmatprep.subr.bf16.mxu1 %v1985_v25 }
  0x7f   :  { %1671 = vmatpush1.bf16.msra.mxu1 %v2008_v31 }
  0x80   :  { %1673 = vmatprep.subr.bf16.mxu1 %v2014_v33 }
  0x83   :  { %1675 = vmatpush1.bf16.msra.mxu1 %v2030_v37 }
  0x84   :  { %1693 = vmatprep.subr.bf16.mxu1 %v1933_v9 }
  0xdc   :  { %v2053_v41 = vpop.f32.mrb[0].mxu1 }
  0xdd   :  { %v133_v42 = vpop.f32.mrb[1].mxu1 }
  0xe0   :  { %v2055_v43 = vpop.f32.mrb[2].mxu1 }
  0xe1   :  { %v2057_v44 = vpop.f32.mrb[3].mxu1 }
  0xe4   :  { %v2059_v45 = vpop.f32.mrb[4].mxu1 }
  0xe5   :  { %v2061_v46 = vpop.f32.mrb[5].mxu1 }
  0xe8   :  { %v2063_v47 = vpop.f32.mrb[6].mxu1 }
  0xe9   :  { %v2065_v48 = vpop.f32.mrb[7].mxu1 }
 0x149   :  { %v297_v55 = vpop.f32.mrb[8].mxu1 }
 0x14a   :  { %v298_v56 = vadd.f32 %v297_v55, %v2070_v54  ;;  %v299_v57 = vpop.f32.mrb[9].mxu1 }
 0x14c   :  { %v302_v60 = vadd.f32 %v298_v56, %v133_v42 }
 0x14e   :  { %v303_v61 = vmul.f32 %v302_v60, %v2073_v59 }
 0x150   :  { %1785 = vtanh.f32 %v303_v61 }
 0x15a   :  { %v1786_v63 = vpop.eup %1785 }
 0x15b   :  { %v305_v0 = vmul.f32 %v1786_v63, %v2073_v59 }
 0x15d   :  { %v306_v1 = vadd.f32 %v305_v0, %v2077_v62 }
 0x15f   :  { %313 = vrot.lane.b32.xlu0 %v306_v1, %s1852_s5  ;;  %v311_v6 = vmul.f32 %v309_v5, %v306_v1 }
 0x1d1   :  { %v314_v3 = vpop.permute.xlu0 %313 }
 0x1d2   :  { %v316_v4 = vmul.f32 %v314_v3, %v306_v1 }
 0x1d4   :  { %318 = vrot.lane.b32.xlu1 %v316_v4, %s1850_s17 }
 0x246   :  { %v319_v7 = vpop.permute.xlu1 %318 }
 0x247   :  { %v321_v8 = vadd.f32 %v319_v7, %v311_v6 }
 0x249   :  { %1787 = vtanh.f32 %v321_v8 }
 0x253   :  { %v1788_v10 = vpop.eup %1787 }
 0x254   :  { %324 = vrot.lane.b32.xlu0 %v1788_v10, %s1852_s5 }
 0x2c6   :  { %v325_v12 = vpop.permute.xlu0 %324 }
 0x2c7   :  { %v327_v13 = vmul.f32 %v325_v12, %v306_v1 }
 0x2c9   :  { %329 = vrot.lane.b32.xlu1 %v327_v13, %s1850_s17 }
 0x33b   :  { %v330_v14 = vpop.permute.xlu1 %329 }
 0x33c   :  { %v332_v16 = vsel %vm214_vm1, %v330_v14, %v212_v39 }
 0x33d   :  { %1547 = vmatmul.mubr.msk.f32.vlgmr.msra.gmra.mrb[0].mxu0 %vm227_vm2, %v332_v16 }
 0x33e   :  { %1679 = vmatpush1.bf16.msra.mxu0 %v1938_v11  ;;  %666 = vmatprep.mubr.f32.mxu0 %v1849_v2 }
 0x33f   :  { %1681 = vmatprep.subr.bf16.mxu0 %v1949_v15 }
 0x342   :  { %1683 = vmatpush1.bf16.msra.mxu0 %v1976_v22 }
 0x343   :  { %1685 = vmatprep.subr.bf16.mxu0 %v1985_v25 }
 0x346   :  { %1687 = vmatpush1.bf16.msra.mxu0 %v2008_v31 }
 0x347   :  { %1689 = vmatprep.subr.bf16.mxu0 %v2014_v33 }
 0x34a   :  { %1691 = vmatpush1.bf16.msra.mxu0 %v2030_v37 }
 0x34b   :  { %1709 = vmatprep.subr.bf16.mxu0 %v1933_v9 }
 0x410   :  { %v402_v19 = vpop.f32.mrb[0].mxu0 }
 0x411   :  { %v403_v20 = vadd.f32 %v402_v19, %v2070_v54  ;;  %v404_v21 = vpop.f32.mrb[1].mxu0 }
 0x412   :  { %v405_v23 = vadd.f32 %v404_v21, %v2096_v18 }
 0x413   :  { %v408_v24 = vadd.f32 %v2053_v41, %v403_v20 }
 0x414   :  { %v430_v26 = vmul.f32 %v405_v23, %v2073_v59 }
 0x415   :  { %v409_v27 = vmul.f32 %v408_v24, %v2073_v59 }
 0x416   :  { %1789 = vtanh.f32 %v430_v26 }
 0x417   :  { %1791 = vtanh.f32 %v409_v27 }
 0x420   :  { %v1790_v28 = vpop.eup %1789 }
 0x421   :  { %v1792_v29 = vpop.eup %1791  ;;  %v432_v30 = vmul.f32 %v1790_v28, %v2073_v59 }
 0x422   :  { %v411_v32 = vmul.f32 %v1792_v29, %v2073_v59 }
 0x423   :  { %v433_v34 = vadd.f32 %v432_v30, %v2077_v62 }
 0x424   :  { %v412_v35 = vadd.f32 %v411_v32, %v2077_v62 }
 0x425   :  { %440 = vrot.lane.b32.xlu1 %v433_v34, %s1852_s5 }
 0x426   :  { %415 = vrot.lane.b32.xlu0 %v412_v35, %s1852_s5  ;;  %v413_v51 = vmul.f32 %v412_v35, %v321_v8 }
 0x42a   :  { %435 = vrot.lane.b32.xlu0 %v1545_v36, %s1850_s17 }
 0x497   :  { %v441_v38 = vpop.permute.xlu1 %440 }
 0x498   :  { %v443_v39 = vmul.f32 %v441_v38, %v433_v34  ;;  %v416_v40 = vpop.permute.xlu0 %415 }
 0x499   :  { %v418_v41 = vmul.f32 %v416_v40, %v412_v35 }
 0x49a   :  { %445 = vrot.lane.b32.xlu0 %v443_v39, %s1850_s17 }
 0x49b   :  { %420 = vrot.lane.b32.xlu1 %v418_v41, %s1850_s17 }
 0x49c   :  { %v436_v42 = vpop.permute.xlu0 %435 }
 0x49d   :  { %v438_v49 = vmul.f32 %v436_v42, %v433_v34 }
 0x50c   :  { %v446_v50 = vpop.permute.xlu0 %445 }
 0x50d   :  { %v448_v52 = vadd.f32 %v446_v50, %v438_v49  ;;  %v421_v53 = vpop.permute.xlu1 %420 }
 0x50e   :  { %v423_v55 = vadd.f32 %v421_v53, %v413_v51 }
 0x50f   :  { %1793 = vtanh.f32 %v448_v52 }
 0x510   :  { %1795 = vtanh.f32 %v423_v55 }
 0x519   :  { %v1794_v56 = vpop.eup %1793 }
 0x51a   :  { %v1796_v57 = vpop.eup %1795  ;;  %451 = vrot.lane.b32.xlu0 %v1794_v56, %s1852_s5 }
 0x51b   :  { %426 = vrot.lane.b32.xlu1 %v1796_v57, %s1852_s5 }
 0x58c   :  { %v452_v58 = vpop.permute.xlu0 %451 }
 0x58d   :  { %v2117_v60 = vmul.f32 %v452_v58, %v433_v34  ;;  %v427_v61 = vpop.permute.xlu1 %426 }
 0x58e   :  { %v429_v63 = vmul.f32 %v427_v61, %v412_v35 }
 0x58f   :  { %464 = vrot.lane.b32.xlu0 %v2117_v60, %s1852_s5 }
 0x590   :  { %461 = vrot.lane.b32.xlu1 %v429_v63, %s1850_s17 }
 0x601   :  { %v465_v0 = vpop.permute.xlu0 %464 }
 0x602   :  { %v462_v1 = vpop.permute.xlu1 %461 }
 0x603   :  { %v467_v3 = vsel %vm214_vm1, %v462_v1, %v465_v0 }
 0x604   :  { %1548 = vmatmul.mubr.msk.f32.vlgmr.msra.gmra.mrb[10].mxu1 %vm227_vm2, %v467_v3 }
 0x605   :  { %1695 = vmatpush1.bf16.msra.mxu1 %v1938_v11  ;;  %797 = vmatprep.mubr.f32.mxu1 %v1849_v2 }
 0x606   :  { %1697 = vmatprep.subr.bf16.mxu1 %v1949_v15 }
 0x609   :  { %1699 = vmatpush1.bf16.msra.mxu1 %v1976_v22 }
 0x60a   :  { %1701 = vmatprep.subr.bf16.mxu1 %v1985_v25 }
 0x60d   :  { %1703 = vmatpush1.bf16.msra.mxu1 %v2008_v31 }
 0x60e   :  { %1705 = vmatprep.subr.bf16.mxu1 %v2014_v33 }
 0x611   :  { %1707 = vmatpush1.bf16.msra.mxu1 %v2030_v37 }
 0x612   :  { %1725 = vmatprep.subr.bf16.mxu1 %v1933_v9 }
 0x6d7   :  { %v537_v4 = vpop.f32.mrb[10].mxu1 }
 0x6d8   :  { %v538_v5 = vadd.f32 %v537_v4, %v2070_v54  ;;  %v539_v6 = vpop.f32.mrb[11].mxu1 }
 0x6d9   :  { %v540_v7 = vadd.f32 %v539_v6, %v2096_v18 }
 0x6da   :  { %v543_v8 = vadd.f32 %v538_v5, %v2057_v44 }
 0x6db   :  { %v565_v10 = vmul.f32 %v540_v7, %v2073_v59 }
 0x6dc   :  { %v544_v12 = vmul.f32 %v543_v8, %v2073_v59 }
 0x6dd   :  { %1797 = vtanh.f32 %v565_v10 }
 0x6de   :  { %1799 = vtanh.f32 %v544_v12 }
 0x6e7   :  { %v1798_v13 = vpop.eup %1797 }
 0x6e8   :  { %v1800_v14 = vpop.eup %1799  ;;  %v567_v16 = vmul.f32 %v1798_v13, %v2073_v59 }
 0x6e9   :  { %v546_v17 = vmul.f32 %v1800_v14, %v2073_v59 }
 0x6ea   :  { %v568_v19 = vadd.f32 %v567_v16, %v2077_v62 }
 0x6eb   :  { %v547_v20 = vadd.f32 %v546_v17, %v2077_v62 }
 0x6ec   :  { %571 = vrot.lane.b32.xlu0 %v568_v19, %s1852_s5  ;;  %v569_v26 = vmul.f32 %v568_v19, %v448_v52 }
 0x6ed   :  { %550 = vrot.lane.b32.xlu1 %v547_v20, %s1852_s5  ;;  %v548_v28 = vmul.f32 %v547_v20, %v423_v55 }
 0x75e   :  { %v572_v44 = vpop.permute.xlu0 %571 }
 0x75f   :  { %v574_v21 = vmul.f32 %v572_v44, %v568_v19  ;;  %v551_v23 = vpop.permute.xlu1 %550 }
 0x760   :  { %v553_v24 = vmul.f32 %v551_v23, %v547_v20 }
 0x761   :  { %576 = vrot.lane.b32.xlu0 %v574_v21, %s1850_s17 }
 0x762   :  { %555 = vrot.lane.b32.xlu1 %v553_v24, %s1850_s17 }
 0x7d3   :  { %v577_v27 = vpop.permute.xlu0 %576 }
 0x7d4   :  { %v579_v29 = vadd.f32 %v577_v27, %v569_v26  ;;  %v556_v30 = vpop.permute.xlu1 %555 }
 0x7d5   :  { %v558_v32 = vadd.f32 %v556_v30, %v548_v28 }
 0x7d6   :  { %1801 = vtanh.f32 %v579_v29 }
 0x7d7   :  { %1803 = vtanh.f32 %v558_v32 }
 0x7e0   :  { %v1802_v34 = vpop.eup %1801 }
 0x7e1   :  { %v1804_v35 = vpop.eup %1803  ;;  %582 = vrot.lane.b32.xlu0 %v1802_v34, %s1852_s5 }
 0x7e2   :  { %561 = vrot.lane.b32.xlu1 %v1804_v35, %s1852_s5 }
 0x853   :  { %v583_v36 = vpop.permute.xlu0 %582 }
 0x854   :  { %v2148_v38 = vmul.f32 %v583_v36, %v568_v19  ;;  %v562_v39 = vpop.permute.xlu1 %561 }
 0x855   :  { %v564_v40 = vmul.f32 %v562_v39, %v547_v20 }
 0x856   :  { %595 = vrot.lane.b32.xlu0 %v2148_v38, %s1852_s5 }
 0x857   :  { %592 = vrot.lane.b32.xlu1 %v564_v40, %s1850_s17 }
 0x8c8   :  { %v596_v41 = vpop.permute.xlu0 %595 }
 0x8c9   :  { %v593_v42 = vpop.permute.xlu1 %592 }
 0x8ca   :  { %v598_v49 = vsel %vm214_vm1, %v593_v42, %v596_v41 }
 0x8cb   :  { %1549 = vmatmul.mubr.msk.f32.vlgmr.msra.gmra.mrb[2].mxu0 %vm227_vm2, %v598_v49 }
 0x8cc   :  { %1711 = vmatpush1.bf16.msra.mxu0 %v1938_v11  ;;  %928 = vmatprep.mubr.f32.mxu0 %v1849_v2 }
 0x8cd   :  { %1713 = vmatprep.subr.bf16.mxu0 %v1949_v15 }
 0x8d0   :  { %1715 = vmatpush1.bf16.msra.mxu0 %v1976_v22 }
 0x8d1   :  { %1717 = vmatprep.subr.bf16.mxu0 %v1985_v25 }
 0x8d4   :  { %1719 = vmatpush1.bf16.msra.mxu0 %v2008_v31 }
 0x8d5   :  { %1721 = vmatprep.subr.bf16.mxu0 %v2014_v33 }
 0x8d8   :  { %1723 = vmatpush1.bf16.msra.mxu0 %v2030_v37 }
 0x8d9   :  { %1741 = vmatprep.subr.bf16.mxu0 %v1933_v9 }
 0x99e   :  { %v668_v50 = vpop.f32.mrb[2].mxu0 }
 0x99f   :  { %v669_v51 = vadd.f32 %v668_v50, %v2070_v54  ;;  %v670_v52 = vpop.f32.mrb[3].mxu0 }
 0x9a0   :  { %v671_v53 = vadd.f32 %v670_v52, %v2096_v18 }
 0x9a1   :  { %v674_v55 = vadd.f32 %v2055_v43, %v669_v51 }
 0x9a2   :  { %v696_v56 = vmul.f32 %v671_v53, %v2073_v59 }
 0x9a3   :  { %v675_v57 = vmul.f32 %v674_v55, %v2073_v59 }
 0x9a4   :  { %1805 = vtanh.f32 %v696_v56 }
 0x9a5   :  { %1807 = vtanh.f32 %v675_v57 }
 0x9ae   :  { %v1806_v58 = vpop.eup %1805 }
 0x9af   :  { %v1808_v61 = vpop.eup %1807  ;;  %v698_v63 = vmul.f32 %v1806_v58, %v2073_v59 }
 0x9b0   :  { %v677_v0 = vmul.f32 %v1808_v61, %v2073_v59 }
 0x9b1   :  { %v699_v1 = vadd.f32 %v698_v63, %v2077_v62 }
 0x9b2   :  { %v678_v3 = vadd.f32 %v677_v0, %v2077_v62 }
 0x9b3   :  { %702 = vrot.lane.b32.xlu0 %v699_v1, %s1852_s5  ;;  %v700_v7 = vmul.f32 %v699_v1, %v579_v29 }
 0x9b4   :  { %681 = vrot.lane.b32.xlu1 %v678_v3, %s1852_s5  ;;  %v679_v10 = vmul.f32 %v678_v3, %v558_v32 }
 0xa25   :  { %v703_v43 = vpop.permute.xlu0 %702 }
 0xa26   :  { %v705_v4 = vmul.f32 %v703_v43, %v699_v1  ;;  %v682_v5 = vpop.permute.xlu1 %681 }
 0xa27   :  { %v684_v6 = vmul.f32 %v682_v5, %v678_v3 }
 0xa28   :  { %707 = vrot.lane.b32.xlu0 %v705_v4, %s1850_s17 }
 0xa29   :  { %686 = vrot.lane.b32.xlu1 %v684_v6, %s1850_s17 }
 0xa9a   :  { %v708_v8 = vpop.permute.xlu0 %707 }
 0xa9b   :  { %v710_v12 = vadd.f32 %v708_v8, %v700_v7  ;;  %v687_v13 = vpop.permute.xlu1 %686 }
 0xa9c   :  { %v689_v14 = vadd.f32 %v687_v13, %v679_v10 }
 0xa9d   :  { %1809 = vtanh.f32 %v710_v12 }
 0xa9e   :  { %1811 = vtanh.f32 %v689_v14 }
 0xaa7   :  { %v1810_v16 = vpop.eup %1809 }
 0xaa8   :  { %v1812_v17 = vpop.eup %1811  ;;  %713 = vrot.lane.b32.xlu0 %v1810_v16, %s1852_s5 }
 0xaa9   :  { %692 = vrot.lane.b32.xlu1 %v1812_v17, %s1852_s5 }
 0xb1a   :  { %v714_v19 = vpop.permute.xlu0 %713 }
 0xb1b   :  { %v2179_v20 = vmul.f32 %v714_v19, %v699_v1  ;;  %v693_v44 = vpop.permute.xlu1 %692 }
 0xb1c   :  { %v695_v21 = vmul.f32 %v693_v44, %v678_v3 }
 0xb1d   :  { %726 = vrot.lane.b32.xlu0 %v2179_v20, %s1852_s5 }
 0xb1e   :  { %723 = vrot.lane.b32.xlu1 %v695_v21, %s1850_s17 }
 0xb8f   :  { %v727_v23 = vpop.permute.xlu0 %726 }
 0xb90   :  { %v724_v24 = vpop.permute.xlu1 %723 }
 0xb91   :  { %v729_v26 = vsel %vm214_vm1, %v724_v24, %v727_v23 }
 0xb92   :  { %1550 = vmatmul.mubr.msk.f32.vlgmr.msra.gmra.mrb[12].mxu1 %vm227_vm2, %v729_v26 }
 0xb93   :  { %1727 = vmatpush1.bf16.msra.mxu1 %v1938_v11  ;;  %1059 = vmatprep.mubr.f32.mxu1 %v1849_v2 }
 0xb94   :  { %1729 = vmatprep.subr.bf16.mxu1 %v1949_v15 }
 0xb97   :  { %1731 = vmatpush1.bf16.msra.mxu1 %v1976_v22 }
 0xb98   :  { %1733 = vmatprep.subr.bf16.mxu1 %v1985_v25 }
 0xb9b   :  { %1735 = vmatpush1.bf16.msra.mxu1 %v2008_v31 }
 0xb9c   :  { %1737 = vmatprep.subr.bf16.mxu1 %v2014_v33 }
 0xb9f   :  { %1739 = vmatpush1.bf16.msra.mxu1 %v2030_v37 }
 0xba0   :  { %1757 = vmatprep.subr.bf16.mxu1 %v1933_v9 }
 0xc65   :  { %v799_v27 = vpop.f32.mrb[12].mxu1 }
 0xc66   :  { %v800_v28 = vadd.f32 %v799_v27, %v2070_v54  ;;  %v801_v29 = vpop.f32.mrb[13].mxu1 }
 0xc67   :  { %v802_v30 = vadd.f32 %v801_v29, %v2096_v18 }
 0xc68   :  { %v805_v32 = vadd.f32 %v800_v28, %v2061_v46 }
 0xc69   :  { %v827_v34 = vmul.f32 %v802_v30, %v2073_v59 }
 0xc6a   :  { %v806_v35 = vmul.f32 %v805_v32, %v2073_v59 }
 0xc6b   :  { %1813 = vtanh.f32 %v827_v34 }
 0xc6c   :  { %1815 = vtanh.f32 %v806_v35 }
 0xc75   :  { %v1814_v36 = vpop.eup %1813 }
 0xc76   :  { %v1816_v39 = vpop.eup %1815  ;;  %v829_v40 = vmul.f32 %v1814_v36, %v2073_v59 }
 0xc77   :  { %v808_v9 = vmul.f32 %v1816_v39, %v2073_v59 }
 0xc78   :  { %v830_v41 = vadd.f32 %v829_v40, %v2077_v62 }
 0xc79   :  { %v809_v42 = vadd.f32 %v808_v9, %v2077_v62 }
 0xc7a   :  { %833 = vrot.lane.b32.xlu0 %v830_v41, %s1852_s5  ;;  %v831_v52 = vmul.f32 %v830_v41, %v710_v12 }
 0xc7b   :  { %812 = vrot.lane.b32.xlu1 %v809_v42, %s1852_s5  ;;  %v810_v55 = vmul.f32 %v809_v42, %v689_v14 }
 0xcec   :  { %v834_v46 = vpop.permute.xlu0 %833 }
 0xced   :  { %v836_v49 = vmul.f32 %v834_v46, %v830_v41  ;;  %v813_v50 = vpop.permute.xlu1 %812 }
 0xcee   :  { %v815_v51 = vmul.f32 %v813_v50, %v809_v42 }
 0xcef   :  { %838 = vrot.lane.b32.xlu0 %v836_v49, %s1850_s17 }
 0xcf0   :  { %817 = vrot.lane.b32.xlu1 %v815_v51, %s1850_s17 }
 0xd61   :  { %v839_v53 = vpop.permute.xlu0 %838 }
 0xd62   :  { %v841_v56 = vadd.f32 %v839_v53, %v831_v52  ;;  %v818_v57 = vpop.permute.xlu1 %817 }
 0xd63   :  { %v820_v58 = vadd.f32 %v818_v57, %v810_v55 }
 0xd64   :  { %1817 = vtanh.f32 %v841_v56 }
 0xd65   :  { %1819 = vtanh.f32 %v820_v58 }
 0xd6e   :  { %v1818_v61 = vpop.eup %1817 }
 0xd6f   :  { %v1820_v63 = vpop.eup %1819  ;;  %844 = vrot.lane.b32.xlu0 %v1818_v61, %s1852_s5 }
 0xd70   :  { %823 = vrot.lane.b32.xlu1 %v1820_v63, %s1852_s5 }
 0xde1   :  { %v845_v0 = vpop.permute.xlu0 %844 }
 0xde2   :  { %v2210_v1 = vmul.f32 %v845_v0, %v830_v41  ;;  %v824_v3 = vpop.permute.xlu1 %823 }
 0xde3   :  { %v826_v43 = vmul.f32 %v824_v3, %v809_v42 }
 0xde4   :  { %857 = vrot.lane.b32.xlu0 %v2210_v1, %s1852_s5 }
 0xde5   :  { %854 = vrot.lane.b32.xlu1 %v826_v43, %s1850_s17 }
 0xe56   :  { %v858_v4 = vpop.permute.xlu0 %857 }
 0xe57   :  { %v855_v5 = vpop.permute.xlu1 %854 }
 0xe58   :  { %v860_v6 = vsel %vm214_vm1, %v855_v5, %v858_v4 }
 0xe59   :  { %1551 = vmatmul.mubr.msk.f32.vlgmr.msra.gmra.mrb[4].mxu0 %vm227_vm2, %v860_v6 }
 0xe5a   :  { %1743 = vmatpush1.bf16.msra.mxu0 %v1938_v11  ;;  %1190 = vmatprep.mubr.f32.mxu0 %v1849_v2 }
 0xe5b   :  { %1745 = vmatprep.subr.bf16.mxu0 %v1949_v15 }
 0xe5e   :  { %1747 = vmatpush1.bf16.msra.mxu0 %v1976_v22 }
 0xe5f   :  { %1749 = vmatprep.subr.bf16.mxu0 %v1985_v25 }
 0xe62   :  { %1751 = vmatpush1.bf16.msra.mxu0 %v2008_v31 }
 0xe63   :  { %1753 = vmatprep.subr.bf16.mxu0 %v2014_v33 }
 0xe66   :  { %1755 = vmatpush1.bf16.msra.mxu0 %v2030_v37 }
 0xf2c   :  { %v930_v7 = vpop.f32.mrb[4].mxu0 }
 0xf2d   :  { %v931_v8 = vadd.f32 %v930_v7, %v2070_v54  ;;  %v932_v10 = vpop.f32.mrb[5].mxu0 }
 0xf2e   :  { %v933_v12 = vadd.f32 %v932_v10, %v2096_v18 }
 0xf2f   :  { %v936_v13 = vadd.f32 %v2059_v45, %v931_v8 }
 0xf30   :  { %v958_v14 = vmul.f32 %v933_v12, %v2073_v59 }
 0xf31   :  { %v937_v16 = vmul.f32 %v936_v13, %v2073_v59 }
 0xf32   :  { %1821 = vtanh.f32 %v958_v14 }
 0xf33   :  { %1823 = vtanh.f32 %v937_v16 }
 0xf3c   :  { %v1822_v17 = vpop.eup %1821 }
 0xf3d   :  { %v1824_v19 = vpop.eup %1823  ;;  %v960_v44 = vmul.f32 %v1822_v17, %v2073_v59 }
 0xf3e   :  { %v939_v21 = vmul.f32 %v1824_v19, %v2073_v59 }
 0xf3f   :  { %v961_v23 = vadd.f32 %v960_v44, %v2077_v62 }
 0xf40   :  { %v940_v24 = vadd.f32 %v939_v21, %v2077_v62 }
 0xf41   :  { %964 = vrot.lane.b32.xlu0 %v961_v23, %s1852_s5  ;;  %v962_v29 = vmul.f32 %v961_v23, %v841_v56 }
 0xf42   :  { %943 = vrot.lane.b32.xlu1 %v940_v24, %s1852_s5  ;;  %v941_v32 = vmul.f32 %v940_v24, %v820_v58 }
 0xfb3   :  { %v965_v45 = vpop.permute.xlu0 %964 }
 0xfb4   :  { %v967_v26 = vmul.f32 %v965_v45, %v961_v23  ;;  %v944_v27 = vpop.permute.xlu1 %943 }
 0xfb5   :  { %v946_v28 = vmul.f32 %v944_v27, %v940_v24 }
 0xfb6   :  { %969 = vrot.lane.b32.xlu0 %v967_v26, %s1850_s17 }
 0xfb7   :  { %948 = vrot.lane.b32.xlu1 %v946_v28, %s1850_s17 }
0x1028   :  { %v970_v30 = vpop.permute.xlu0 %969 }
0x1029   :  { %v972_v34 = vadd.f32 %v970_v30, %v962_v29  ;;  %v949_v35 = vpop.permute.xlu1 %948 }
0x102a   :  { %v951_v36 = vadd.f32 %v949_v35, %v941_v32 }
0x102b   :  { %1825 = vtanh.f32 %v972_v34 }
0x102c   :  { %1827 = vtanh.f32 %v951_v36 }
0x1035   :  { %v1826_v39 = vpop.eup %1825 }
0x1036   :  { %v1828_v40 = vpop.eup %1827  ;;  %975 = vrot.lane.b32.xlu0 %v1826_v39, %s1852_s5 }
0x1037   :  { %954 = vrot.lane.b32.xlu1 %v1828_v40, %s1852_s5 }
0x10a8   :  { %v976_v9 = vpop.permute.xlu0 %975 }
0x10a9   :  { %v2240_v41 = vmul.f32 %v976_v9, %v961_v23  ;;  %v955_v42 = vpop.permute.xlu1 %954 }
0x10aa   :  { %v957_v46 = vmul.f32 %v955_v42, %v940_v24 }
0x10ab   :  { %988 = vrot.lane.b32.xlu0 %v2240_v41, %s1852_s5 }
0x10ac   :  { %985 = vrot.lane.b32.xlu1 %v957_v46, %s1850_s17 }
0x111d   :  { %v989_v49 = vpop.permute.xlu0 %988 }
0x111e   :  { %v986_v50 = vpop.permute.xlu1 %985 }
0x111f   :  { %v991_v51 = vsel %vm214_vm1, %v986_v50, %v989_v49 }
0x1120   :  { %1552 = vmatmul.mubr.msk.f32.vlgmr.msra.gmra.mrb[14].mxu1 %vm227_vm2, %v991_v51 }
0x1121   :  { %1759 = vmatpush1.bf16.msra.mxu1 %v1938_v11  ;;  %1321 = vmatprep.mubr.f32.mxu1 %v1849_v2 }
0x1122   :  { %1761 = vmatprep.subr.bf16.mxu1 %v1949_v15 }
0x1125   :  { %1763 = vmatpush1.bf16.msra.mxu1 %v1976_v22 }
0x1126   :  { %1765 = vmatprep.subr.bf16.mxu1 %v1985_v25 }
0x1129   :  { %1767 = vmatpush1.bf16.msra.mxu1 %v2008_v31 }
0x112a   :  { %1769 = vmatprep.subr.bf16.mxu1 %v2014_v33 }
0x112d   :  { %1771 = vmatpush1.bf16.msra.mxu1 %v2030_v37 }
0x11f3   :  { %v1061_v52 = vpop.f32.mrb[14].mxu1 }
0x11f4   :  { %v1062_v53 = vadd.f32 %v1061_v52, %v2070_v54  ;;  %v1063_v55 = vpop.f32.mrb[15].mxu1 }
0x11f5   :  { %v1064_v11 = vadd.f32 %v1063_v55, %v2096_v18 }
0x11f6   :  { %v1067_v2 = vadd.f32 %v1062_v53, %v2065_v48 }
0x11f7   :  { %v1089_v15 = vmul.f32 %v1064_v11, %v2073_v59 }
0x11f8   :  { %v1068_v22 = vmul.f32 %v1067_v2, %v2073_v59 }
0x11f9   :  { %1829 = vtanh.f32 %v1089_v15 }
0x11fa   :  { %1831 = vtanh.f32 %v1068_v22 }
0x1203   :  { %v1830_v25 = vpop.eup %1829 }
0x1204   :  { %v1832_v31 = vpop.eup %1831  ;;  %v1091_v33 = vmul.f32 %v1830_v25, %v2073_v59 }
0x1205   :  { %v1070_v37 = vmul.f32 %v1832_v31, %v2073_v59 }
0x1206   :  { %v1092_v56 = vadd.f32 %v1091_v33, %v2077_v62 }
0x1207   :  { %v1071_v57 = vadd.f32 %v1070_v37, %v2077_v62 }
0x1208   :  { %1095 = vrot.lane.b32.xlu0 %v1092_v56, %s1852_s5  ;;  %v1093_v0 = vmul.f32 %v1092_v56, %v972_v34 }
0x1209   :  { %1074 = vrot.lane.b32.xlu1 %v1071_v57, %s1852_s5  ;;  %v1072_v43 = vmul.f32 %v1071_v57, %v951_v36 }
0x127a   :  { %v1096_v48 = vpop.permute.xlu0 %1095 }
0x127b   :  { %v1098_v58 = vmul.f32 %v1096_v48, %v1092_v56  ;;  %v1075_v61 = vpop.permute.xlu1 %1074 }
0x127c   :  { %v1077_v63 = vmul.f32 %v1075_v61, %v1071_v57 }
0x127d   :  { %1100 = vrot.lane.b32.xlu0 %v1098_v58, %s1850_s17 }
0x127e   :  { %1079 = vrot.lane.b32.xlu1 %v1077_v63, %s1850_s17 }
0x12ef   :  { %v1101_v3 = vpop.permute.xlu0 %1100 }
0x12f0   :  { %v1103_v4 = vadd.f32 %v1101_v3, %v1093_v0  ;;  %v1080_v5 = vpop.permute.xlu1 %1079  ;;  %v1375_v0 = vld [vmem:[%s2405_s6] sm:$0xff] }
0x12f1   :  { %v1082_v6 = vadd.f32 %v1080_v5, %v1072_v43  ;;  %v1378_v43 = vld [vmem:[%s2405_s6 + $0x18] sm:$0xff] }
0x12f2   :  { %1833 = vtanh.f32 %v1103_v4 }
0x12f3   :  { %1835 = vtanh.f32 %v1082_v6 }
0x12fc   :  { %v1834_v7 = vpop.eup %1833 }
0x12fd   :  { %v1836_v8 = vpop.eup %1835  ;;  %1106 = vrot.lane.b32.xlu0 %v1834_v7, %s1852_s5 }
0x12fe   :  { %1085 = vrot.lane.b32.xlu1 %v1836_v8, %s1852_s5 }
0x136f   :  { %v1107_v10 = vpop.permute.xlu0 %1106 }
0x1370   :  { %v2270_v12 = vmul.f32 %v1107_v10, %v1092_v56  ;;  %v1086_v13 = vpop.permute.xlu1 %1085 }
0x1371   :  { %v1088_v14 = vmul.f32 %v1086_v13, %v1071_v57 }
0x1372   :  { %1119 = vrot.lane.b32.xlu0 %v2270_v12, %s1852_s5 }
0x1373   :  { %1116 = vrot.lane.b32.xlu1 %v1088_v14, %s1850_s17 }
0x13e4   :  { %v1120_v16 = vpop.permute.xlu0 %1119 }
0x13e5   :  { %v1117_v17 = vpop.permute.xlu1 %1116 }
0x13e6   :  { %v1122_v19 = vsel %vm214_vm1, %v1117_v17, %v1120_v16 }
0x13e7   :  { %1553 = vmatmul.mubr.msk.f32.vlgmr.msra.gmra.mrb[6].mxu0 %vm227_vm2, %v1122_v19 }
0x14ba   :  { %v1192_v44 = vpop.f32.mrb[6].mxu0 }
0x14bb   :  { %v1193_v21 = vadd.f32 %v1192_v44, %v2070_v54  ;;  %v1194_v23 = vpop.f32.mrb[7].mxu0 }
0x14bc   :  { %v1195_v24 = vadd.f32 %v1194_v23, %v2096_v18 }
0x14bd   :  { %v1198_v45 = vadd.f32 %v2063_v47, %v1193_v21 }
0x14be   :  { %v1220_v26 = vmul.f32 %v1195_v24, %v2073_v59 }
0x14bf   :  { %v1199_v27 = vmul.f32 %v1198_v45, %v2073_v59 }
0x14c0   :  { %1837 = vtanh.f32 %v1220_v26 }
0x14c1   :  { %1839 = vtanh.f32 %v1199_v27 }
0x14ca   :  { %v1838_v28 = vpop.eup %1837 }
0x14cb   :  { %v1840_v29 = vpop.eup %1839  ;;  %v1222_v30 = vmul.f32 %v1838_v28, %v2073_v59  ;;  %v1557_v28 = vld [vmem:[%s2407_s7] ss:$0 sm:$0xff] }
0x14cc   :  { %v1201_v32 = vmul.f32 %v1840_v29, %v2073_v59 }
0x14cd   :  { %v1223_v34 = vadd.f32 %v1222_v30, %v2077_v62 }
0x14ce   :  { %v1202_v54 = vadd.f32 %v1201_v32, %v2077_v62 }
0x14cf   :  { %1226 = vrot.lane.b32.xlu0 %v1223_v34, %s1852_s5  ;;  %v1224_v40 = vmul.f32 %v1223_v34, %v1103_v4 }
0x14d0   :  { %1205 = vrot.lane.b32.xlu1 %v1202_v54, %s1852_s5  ;;  %v1203_v42 = vmul.f32 %v1202_v54, %v1082_v6 }
0x1541   :  { %v1227_v47 = vpop.permute.xlu0 %1226 }
0x1542   :  { %v1229_v35 = vmul.f32 %v1227_v47, %v1223_v34  ;;  %v1206_v36 = vpop.permute.xlu1 %1205 }
0x1543   :  { %v1208_v39 = vmul.f32 %v1206_v36, %v1202_v54 }
0x1544   :  { %1231 = vrot.lane.b32.xlu0 %v1229_v35, %s1850_s17 }
0x1545   :  { %1210 = vrot.lane.b32.xlu1 %v1208_v39, %s1850_s17 }
0x15b6   :  { %v1232_v9 = vpop.permute.xlu0 %1231 }
0x15b7   :  { %v1234_v46 = vadd.f32 %v1232_v9, %v1224_v40  ;;  %v1211_v49 = vpop.permute.xlu1 %1210 }
0x15b8   :  { %v1213_v50 = vadd.f32 %v1211_v49, %v1203_v42 }
0x15b9   :  { %1841 = vtanh.f32 %v1234_v46 }
0x15ba   :  { %1843 = vtanh.f32 %v1213_v50 }
0x15c3   :  { %v1842_v51 = vpop.eup %1841 }
0x15c4   :  { %v1844_v52 = vpop.eup %1843  ;;  %1237 = vrot.lane.b32.xlu0 %v1842_v51, %s1852_s5 }
0x15c5   :  { %1216 = vrot.lane.b32.xlu1 %v1844_v52, %s1852_s5 }
0x1636   :  { %v1238_v53 = vpop.permute.xlu0 %1237 }
0x1637   :  { %v1240_v55 = vmul.f32 %v1238_v53, %v1223_v34  ;;  %v1217_v11 = vpop.permute.xlu1 %1216 }
0x1638   :  { %v1219_v2 = vmul.f32 %v1217_v11, %v1202_v54 }
0x1639   :  { %1250 = vrot.lane.b32.xlu0 %v1240_v55, %s1852_s5 }
0x163a   :  { %1247 = vrot.lane.b32.xlu1 %v1219_v2, %s1850_s17 }
0x16ab   :  { %v1251_v15 = vpop.permute.xlu0 %1250 }
0x16ac   :  { %v1248_v22 = vpop.permute.xlu1 %1247 }
0x16ad   :  { %v1253_v25 = vsel %vm214_vm1, %v1248_v22, %v1251_v15  ;;  %1353 = vst.msk [vmem:[%s2404_s9] sm:$0xff] %vm214_vm1, %v1248_v22 }
0x16ae   :  { %1554 = vmatmul.mubr.msk.f32.vlgmr.msra.gmra.mrb[16].mxu1 %vm227_vm2, %v1253_v25 }
0x1781   :  { %v1323_v31 = vpop.f32.mrb[16].mxu1 }
0x1782   :  { %v1324_v33 = vpop.f32.mrb[17].mxu1 }
0x1783   :  { %v1325_v37 = vadd.f32 %v1324_v33, %v2096_v18 }
0x1785   :  { %v1327_v56 = vmul.f32 %v1325_v37, %v2073_v59 }
0x1787   :  { %1845 = vtanh.f32 %v1327_v56 }
0x1791   :  { %v1846_v57 = vpop.eup %1845 }
0x1792   :  { %v1329_v48 = vmul.f32 %v1846_v57, %v2073_v59 }
0x1794   :  { %v1330_v58 = vadd.f32 %v1329_v48, %v2077_v62 }
0x1796   :  { %1333 = vrot.lane.b32.xlu1 %v1330_v58, %s1852_s5  ;;  %v1331_v59 = vmul.f32 %v1330_v58, %v1234_v46 }
0x1808   :  { %v1334_v61 = vpop.permute.xlu1 %1333 }
0x1809   :  { %v1336_v63 = vmul.f32 %v1334_v61, %v1330_v58 }
0x180b   :  { %1338 = vrot.lane.b32.xlu0 %v1336_v63, %s1850_s17 }
0x180f   :  { %456 = vrot.lane.b32.xlu0 %v2117_v60, %s1850_s17  ;;  %v1376_v60 = vld [vmem:[%s2405_s6 + $0x8] sm:$0xff] }
0x1813   :  { %718 = vrot.lane.b32.xlu0 %v2179_v20, %s1850_s17  ;;  %v1772_v20 = vpack.c.bf16 %v1376_v60, %v1375_v0 }
0x1815   :  { %1773 = vmatprep.subr.bf16.mxu0 %v1772_v20 }
0x1816   :  { %1775 = vmatpush3.bf16.msra.mxu0 %v1772_v20 }
0x1817   :  { %980 = vrot.lane.b32.xlu0 %v2240_v41, %s1850_s17  ;;  %v1377_v41 = vld [vmem:[%s2405_s6 + $0x10] sm:$0xff] }
0x1818   :  { %v1776_v4 = vpack.c.bf16 %v1378_v43, %v1377_v41 }
0x181a   :  { %1777 = vmatprep.subr.bf16.mxu0 %v1776_v4 }
0x181b   :  { %1242 = vrot.lane.b32.xlu0 %v1240_v55, %s1850_s17  ;;  %1779 = vmatpush3.bf16.msra.mxu0 %v1776_v4 }
0x181f   :  { %1355 = vrot.lane.b32.xlu0 %v1213_v50, %s1853_s13 }
0x187d   :  { %v1339_v62 = vpop.permute.xlu0 %1338 }
0x187e   :  { %v1341_v18 = vadd.f32 %v1339_v62, %v1331_v59 }
0x1880   :  { %1847 = vtanh.f32 %v1341_v18 }
0x1881   :  { %v457_v3 = vpop.permute.xlu0 %456 }
0x1882   :  { %459 = vst.msk [vmem:[#allocation3] sm:$0xff] %vm214_vm1, %v457_v3 }
0x1885   :  { %v719_v5 = vpop.permute.xlu0 %718 }
0x1886   :  { %721 = vst.msk [vmem:[#allocation3 + $0x10] sm:$0xff] %vm214_vm1, %v719_v5 }
0x1889   :  { %v981_v6 = vpop.permute.xlu0 %980  ;;  %v1367_v7 = vld [vmem:[#allocation3] sm:$0xff] }
0x188a   :  { %v1848_v8 = vpop.eup %1847  ;;  %983 = vst.msk [vmem:[#allocation3 + $0x20] sm:$0xff] %vm214_vm1, %v981_v6  ;;  %1612 = vmatprep.mubr.msk.f32.mxu0 %vm214_vm1, %v1367_v7 }
0x188b   :  { %1344 = vrot.lane.b32.xlu1 %v1848_v8, %s1852_s5 }
0x188d   :  { %v1243_v10 = vpop.permute.xlu0 %1242 }
0x188e   :  { %1245 = vst.msk [vmem:[#allocation3 + $0x30] sm:$0xff] %vm214_vm1, %v1243_v10 }
0x188f   :  { %587 = vrot.lane.b32.xlu1 %v2148_v38, %s1850_s17 }
0x1891   :  { %v1356_v13 = vpop.permute.xlu0 %1355  ;;  %v1371_v21 = vld [vmem:[#allocation3 + $0x20] sm:$0xff] }
0x1892   :  { %1358 = vst.msk [vmem:[%s2406_s10] sm:$0xff] %vm214_vm1, %v1356_v13 }
0x1893   :  { %849 = vrot.lane.b32.xlu1 %v2210_v1, %s1850_s17  ;;  %v1369_v1 = vld [vmem:[#allocation3 + $0x10] sm:$0xff] }
0x1895   :  { %v1373_v24 = vld [vmem:[#allocation3 + $0x30] sm:$0xff] }
0x1897   :  { %1111 = vrot.lane.b32.xlu1 %v2270_v12, %s1850_s17 }
0x18fd   :  { %v1345_v14 = vpop.permute.xlu1 %1344 }
0x18fe   :  { %v1347_v16 = vmul.f32 %v1345_v14, %v1330_v58 }
0x1900   :  { %1349 = vrot.lane.b32.xlu1 %v1347_v16, %s1850_s17 }
0x1901   :  { %v588_v17 = vpop.permute.xlu1 %587 }
0x1902   :  { %590 = vst.msk [vmem:[#allocation3 + $0x8] sm:$0xff] %vm214_vm1, %v588_v17 }
0x1904   :  { %1362 = vrot.lane.b32.xlu1 %v1341_v18, %s1853_s13 }
0x1905   :  { %v850_v38 = vpop.permute.xlu1 %849 }
0x1906   :  { %852 = vst.msk [vmem:[#allocation3 + $0x18] sm:$0xff] %vm214_vm1, %v850_v38 }
0x1909   :  { %v1112_v19 = vpop.permute.xlu1 %1111  ;;  %v1368_v44 = vld [vmem:[#allocation3 + $0x8] sm:$0xff] }
0x190a   :  { %1114 = vst.msk [vmem:[#allocation3 + $0x28] sm:$0xff] %vm214_vm1, %v1112_v19  ;;  %1613 = vmatmul.mubr.msk.f32.vlgmr.msra.gmra.mrb[8].mxu0 %vm214_vm1, %v1368_v44 }
0x190b   :  { %1615 = vmatprep.mubr.msk.f32.mxu0 %vm214_vm1, %v1369_v1 }
0x190d   :  { %v1370_v12 = vld [vmem:[#allocation3 + $0x18] sm:$0xff] }
0x190e   :  { %1616 = vmatmul.mubr.msk.f32.gmra.mrb[10].mxu0 %vm214_vm1, %v1370_v12 }
0x190f   :  { %1618 = vmatprep.mubr.msk.f32.mxu0 %vm214_vm1, %v1371_v21 }
0x1911   :  { %v1372_v23 = vld [vmem:[#allocation3 + $0x28] sm:$0xff] }
0x1912   :  { %1619 = vmatmul.mubr.msk.f32.gmra.mrb[12].mxu0 %vm214_vm1, %v1372_v23 }
0x1913   :  { %1621 = vmatprep.mubr.msk.f32.mxu0 %vm214_vm1, %v1373_v24 }
0x1972   :  { %v1350_v45 = vpop.permute.xlu1 %1349 }
0x1973   :  { %1352 = vst.msk [vmem:[#allocation3 + $0x38] sm:$0xff] %vm214_vm1, %v1350_v45  ;;  %1555 = vst.msk [vmem:[%s2404_s9 + $0x8] sm:$0xff] %vm214_vm1, %v1350_v45 }
0x1976   :  { %v1363_v26 = vpop.permute.xlu1 %1362 }
0x1977   :  { %1556 = vst.msk [vmem:[%s2406_s10 + $0x8] sm:$0xff] %vm214_vm1, %v1363_v26 }
0x197a   :  { %v1374_v27 = vld [vmem:[#allocation3 + $0x38] sm:$0xff] }
0x197b   :  { %1622 = vmatmul.mubr.msk.f32.gmra.mrb[14].mxu0 %vm214_vm1, %v1374_v27 }
0x19dd   :  { %v1614_v29 = vpop.f32.mrb[8].mxu0 }
0x19de   :  { %v1482_v30 = vadd.f32 %v1614_v29, %v1557_v28  ;;  %v1476_v32 = vpop.f32.mrb[9].mxu0 }
0x19df   :  { %v1477_v34 = vadd.f32 %v1557_v28, %v1476_v32 }
0x19e0   :  { %1517 = vst.msk [vmem:[%s2408_s8 + $0x8] sm:$0xff] %vm1515_vm6, %v1482_v30 }
0x19e1   :  { %1516 = vst.msk [vmem:[%s2408_s8] sm:$0xff] %vm1515_vm6, %v1477_v34  ;;  %v1617_v54 = vpop.f32.mrb[10].mxu0 }
0x19e2   :  { %v1492_v47 = vadd.f32 %v1617_v54, %v1557_v28  ;;  %v1486_v35 = vpop.f32.mrb[11].mxu0 }
0x19e3   :  { %v1487_v36 = vadd.f32 %v1557_v28, %v1486_v35 }
0x19e4   :  { %1519 = vst.msk [vmem:[%s2408_s8 + $0x18] sm:$0xff] %vm1515_vm6, %v1492_v47 }
0x19e5   :  { %1518 = vst.msk [vmem:[%s2408_s8 + $0x10] sm:$0xff] %vm1515_vm6, %v1487_v36  ;;  %v1620_v39 = vpop.f32.mrb[12].mxu0 }
0x19e6   :  { %v1502_v40 = vadd.f32 %v1620_v39, %v1557_v28  ;;  %v1496_v9 = vpop.f32.mrb[13].mxu0 }
0x19e7   :  { %v1497_v42 = vadd.f32 %v1557_v28, %v1496_v9 }
0x19e8   :  { %1521 = vst.msk [vmem:[%s2408_s8 + $0x28] sm:$0xff] %vm1515_vm6, %v1502_v40 }
0x19e9   :  { %1520 = vst.msk [vmem:[%s2408_s8 + $0x20] sm:$0xff] %vm1515_vm6, %v1497_v42 }
0x1a4e   :  { %v1623_v46 = vpop.f32.mrb[14].mxu0 }
0x1a4f   :  { %v1512_v49 = vadd.f32 %v1623_v46, %v1557_v28  ;;  %v1506_v50 = vpop.f32.mrb[15].mxu0 }
0x1a50   :  { %v1507_v51 = vadd.f32 %v1557_v28, %v1506_v50 }
0x1a51   :  { %1523 = vst.msk [vmem:[%s2408_s8 + $0x38] sm:$0xff] %vm1515_vm6, %v1512_v49 }
0x1a52   :  { %1522 = vst.msk [vmem:[%s2408_s8 + $0x30] sm:$0xff] %vm1515_vm6, %v1507_v51 }

</bundles_post_ra>
